<compile_context>
chip_gen: v7x
topology: tpu7x:2x2x1
jax: 0.10.0
libtpu: 0.0.40
codegen_flags: <defaults>
</compile_context>

<pallas_src>
import functools

import jax
import jax.numpy as jnp
from jax.experimental import pallas as pl
from jax.experimental.pallas import tpu as pltpu


def _make_gather_kernel(rows_per_step: int, num_valid: int):
    """Kernel gathering `rows_per_step` bank rows per grid step.

    Rows whose global index is >= num_valid (possible only on the last grid
    step when num_valid % rows_per_step != 0) are skipped entirely, so no
    output padding / post-slice is needed.
    """
    need_guard = (num_valid % rows_per_step) != 0

    def kernel(idx_ref, src_hbm, out_ref, sem):
        g = pl.program_id(0)
        base = pl.multiple_of(g * rows_per_step, rows_per_step)

        def start_row(r):
            row = idx_ref[base + r]
            pltpu.make_async_copy(src_hbm.at[row], out_ref.at[r], sem).start()

        def wait_row(r):
            # The source row index is irrelevant for wait (only the transfer
            # size / semaphore matter); all row copies are the same size, so
            # waiting in issue order on the shared semaphore is exact.
            pltpu.make_async_copy(src_hbm.at[0], out_ref.at[r], sem).wait()

        # Start every row DMA first so all of them are in flight, then wait.
        for r in range(rows_per_step):
            if need_guard:
                pl.when(base + r < num_valid)(functools.partial(start_row, r))
            else:
                start_row(r)
        for r in range(rows_per_step):
            if need_guard:
                pl.when(base + r < num_valid)(functools.partial(wait_row, r))
            else:
                wait_row(r)

    return kernel


def gather_rows(bank, idx, *, rows_per_step=None,
                vmem_budget_bytes=8 * 1024 * 1024):
    """Return bank[idx] (row gather) via a single Pallas DMA-gather kernel.

    bank: (num_rows, width) array, kept in HBM.
    idx:  (n,) integer row indices.
    """
    assert bank.ndim == 2 and idx.ndim == 1
    num_rows, width = bank.shape
    n = int(idx.shape[0])

    row_bytes = int(width) * jnp.dtype(bank.dtype).itemsize

    if rows_per_step is None:
        # Largest row group whose double-buffered output block fits the
        # conservative cross-generation VMEM budget; multiple of 8, <= 128.
        r = vmem_budget_bytes // (2 * max(row_bytes, 1))
        r = int(max(8, min(128, (r // 8) * 8)))
    else:
        r = int(rows_per_step)
    # Don't allocate a block much larger than the request itself.
    r = min(r, max(8, ((n + 7) // 8) * 8))

    # Clamp: Pallas does no bounds checking on DMA source row indices.
    # TODO(synk): torch would error on out-of-range indices; internally
    # generated indices are always in range, so this is a pure safeguard.
    idx32 = jnp.clip(idx.astype(jnp.int32), 0, num_rows - 1)

    kernel = _make_gather_kernel(r, n)

    grid_spec = pltpu.PrefetchScalarGridSpec(
        num_scalar_prefetch=1,
        grid=(pl.cdiv(n, r),),
        in_specs=[pl.BlockSpec(memory_space=pl.ANY)],   # bank stays in HBM
        out_specs=pl.BlockSpec((r, width), lambda i, idx_ref: (i, 0)),
        scratch_shapes=[pltpu.SemaphoreType.DMA(())],
    )

    # Double-buffered output block + slack; stays within every generation's
    # scoped-VMEM budget because rows_per_step was sized against it.
    vmem_limit = int(min(max(3 * r * row_bytes + (2 << 20), 16 << 20), 32 << 20))

    return pl.pallas_call(
        kernel,
        grid_spec=grid_spec,
        out_shape=jax.ShapeDtypeStruct((n, width), bank.dtype),
        compiler_params=pltpu.CompilerParams(
            dimension_semantics=("parallel",),
            vmem_limit_bytes=vmem_limit,
        ),
    )(idx32, bank)


class WaveformSampler:
    """JAX/Pallas port of ml4gw.transforms.waveforms.WaveformSampler."""

    def __init__(self, parameters=None, **polarizations):
        num_waveforms = None
        pols = {}
        for polarization, tensor in polarizations.items():
            t = jnp.asarray(tensor)
            if num_waveforms is not None and t.shape[0] != num_waveforms:
                raise ValueError(
                    "Polarization {} has {} waveforms associated with it, "
                    "expected {}".format(
                        polarization, t.shape[0], num_waveforms))
            elif num_waveforms is None:
                num_waveforms = t.shape[0]
            pols[polarization] = t
        if parameters is not None and len(parameters) != num_waveforms:
            raise ValueError(
                "Waveform parameters has {} waveforms associated with it, "
                "expected {}".format(len(parameters), num_waveforms))

        self.num_waveforms = num_waveforms
        self.parameters = (
            None if parameters is None else jnp.asarray(parameters))
        self.keys = list(pols.keys())

        lengths = {int(v.shape[1]) for v in pols.values()}
        dtypes = {v.dtype for v in pols.values()}
        if len(lengths) == 1 and len(dtypes) == 1:
            # Pack all polarizations into one bank so each sampled waveform
            # is one wide DMA.  Only the packed bank is stored, avoiding a
            # duplicate copy of a potentially large waveform bank.
            self.waveform_size = lengths.pop()
            self._bank = jnp.concatenate(
                [pols[k] for k in self.keys], axis=1)
            self._pols = None
        else:
            # Heterogeneous lengths/dtypes: gather each tensor with its own
            # (still fused, large-row-group) DMA-gather kernel.
            self.waveform_size = None
            self._bank = None
            self._pols = pols

    def _split(self, stacked):
        # Cheap per-polarization slices of the packed output; they fuse with
        # downstream consumers under jit.
        n = stacked.shape[0]
        p = len(self.keys)
        cube = stacked.reshape(n, p, self.waveform_size)
        return {k: cube[:, i, :] for i, k in enumerate(self.keys)}

    def __call__(self, N: int, key=None):
        if N == -1:
            # "Take everything, in order" — the gather is the identity, so
            # skip the kernel entirely (saves a full read+write HBM pass).
            if self._bank is not None:
                waveforms = self._split(self._bank)
            else:
                waveforms = dict(self._pols)
            if self.parameters is not None:
                return waveforms, self.parameters
            return waveforms

        if N > self.num_waveforms:
            raise ValueError(
                "Requested {} waveforms, but only {} are available".format(
                    N, self.num_waveforms))

        # torch.randint(self.num_waveforms, size=(N,)) equivalent.
        # TODO(synk): torch's host-side global RNG has no direct JAX
        # equivalent; an explicit PRNG key is required instead.
        idx = jax.random.randint(
            key, (N,), 0, self.num_waveforms, dtype=jnp.int32)

        if self._bank is not None:
            stacked = gather_rows(self._bank, idx)
            waveforms = self._split(stacked)
        else:
            waveforms = {k: gather_rows(v, idx)
                         for k, v in self._pols.items()}

        if self.parameters is not None:
            # Tiny (num_params-wide) rows: plain XLA gather beats a Pallas
            # kernel with <1%-utilized padded tiles.
            sampled_params = jnp.take(self.parameters, idx, axis=0)
            return waveforms, sampled_params
        return waveforms


if __name__ == "__main__":
    key = jax.random.PRNGKey(0)
    k_plus, k_cross, k_params, k_idx, k_idx2 = jax.random.split(key, 5)

    # Deterministic synthetic waveform bank (small shapes).
    num_waveforms = 32
    time = 256          # multiple of 128 -> lane-dense output blocks
    num_params = 8

    plus = jax.random.normal(k_plus, (num_waveforms, time), dtype=jnp.float32)
    cross = jax.random.normal(
        k_cross, (num_waveforms, time), dtype=jnp.float32)
    params = jax.random.normal(
        k_params, (num_waveforms, num_params), dtype=jnp.float32)

    sampler = WaveformSampler(parameters=params, plus=plus, cross=cross)

    # N = 12 is deliberately NOT a multiple of the row-group size so the
    # in-kernel pl.when tail guard is exercised (no pad + slice anymore).
    N = 12
    waveforms, sampled_params = sampler(N, k_idx)
    waveforms = jax.tree_util.tree_map(jax.block_until_ready, waveforms)
    sampled_params = jax.block_until_ready(sampled_params)

    # Correctness check against a pure-JAX reference gather.
    idx_ref = jax.random.randint(
        k_idx, (N,), 0, num_waveforms, dtype=jnp.int32)
    assert waveforms["plus"].shape == (N, time)
    assert waveforms["cross"].shape == (N, time)
    assert sampled_params.shape == (N, num_params)
    assert jnp.array_equal(waveforms["plus"], plus[idx_ref])
    assert jnp.array_equal(waveforms["cross"], cross[idx_ref])
    assert jnp.array_equal(sampled_params, params[idx_ref])

    # N == -1 "take everything" short-circuit path (no kernel launch).
    all_waveforms, all_params = sampler(-1, None)
    all_waveforms = jax.tree_util.tree_map(
        jax.block_until_ready, all_waveforms)
    assert jnp.array_equal(all_waveforms["plus"], plus)
    assert jnp.array_equal(all_waveforms["cross"], cross)
    assert jnp.array_equal(jax.block_until_ready(all_params), params)

    # Heterogeneous-length fallback path (per-tensor gather kernels).
    hp = jax.random.normal(k_plus, (num_waveforms, 384), dtype=jnp.float32)
    hc = jax.random.normal(k_cross, (num_waveforms, 256), dtype=jnp.float32)
    sampler2 = WaveformSampler(plus=hp, cross=hc)
    N2 = 16
    wf2 = sampler2(N2, k_idx2)
    wf2 = jax.tree_util.tree_map(jax.block_until_ready, wf2)
    idx2 = jax.random.randint(
        k_idx2, (N2,), 0, num_waveforms, dtype=jnp.int32)
    assert jnp.array_equal(wf2["plus"], hp[idx2])
    assert jnp.array_equal(wf2["cross"], hc[idx2])

    print("KERNEL_OK")
</pallas_src>

<mosaic_0001>
module attributes {stable_mosaic.version = 11 : i64} {
  func.func @kernel(%arg0: i32, %arg1: memref<12xi32, #tpu.memory_space<smem>>, %arg2: memref<32x512xf32, #tpu.memory_space<any>>, %arg3: memref<16x512xf32, #tpu.memory_space<vmem>>, %arg4: memref<!tpu.dma_semaphore, #tpu.memory_space<semaphore_mem>>) attributes {dimension_semantics = [#tpu.dimension_semantics<parallel>], iteration_bounds = array<i64: 1>, scalar_prefetch = 1 : i64, scratch_operands = 1 : i64, tpu.core_type = #tpu.core_type<tc>, window_params = [{}, {transform_indices = @transform_1, window_bounds = array<i64: 16, 512>}]} {
    %c16_i32 = arith.constant 16 : i32
    %0 = arith.muli %arg0, %c16_i32 : i32
    %1 = tpu.assume_multiple %0, 16 : i32
    %c0_i32 = arith.constant 0 : i32
    %2 = arith.addi %1, %c0_i32 : i32
    %c12_i32 = arith.constant 12 : i32
    %3 = arith.cmpi slt, %2, %c12_i32 : i32
    %4 = arith.extui %3 : i1 to i32
    %c0_i32_0 = arith.constant 0 : i32
    %5 = arith.cmpi ne, %4, %c0_i32_0 : i32
    scf.if %5 {
      %c0_i32_80 = arith.constant 0 : i32
      %130 = arith.addi %1, %c0_i32_80 : i32
      %131 = arith.index_cast %130 : i32 to index
      %132 = memref.load %arg1[%131] : memref<12xi32, #tpu.memory_space<smem>>
      %c0_i32_81 = arith.constant 0 : i32
      %c0_i32_82 = arith.constant 0 : i32
      %133 = tpu.memref_slice %arg2[%132, %c0_i32_82] : memref<32x512xf32, #tpu.memory_space<any>> -> memref<1x512xf32, #tpu.memory_space<any>>
      %134 = tpu.memref_squeeze %133 : memref<1x512xf32, #tpu.memory_space<any>> -> memref<512xf32, #tpu.memory_space<any>>
      %c0_i32_83 = arith.constant 0 : i32
      %135 = tpu.memref_slice %arg3[%c0_i32_81, %c0_i32_83] : memref<16x512xf32, #tpu.memory_space<vmem>> -> memref<1x512xf32, #tpu.memory_space<vmem>>
      %136 = tpu.memref_squeeze %135 : memref<1x512xf32, #tpu.memory_space<vmem>> -> memref<512xf32, #tpu.memory_space<vmem>>
      tpu.enqueue_dma source(%134 : memref<512xf32, #tpu.memory_space<any>>) target(%136 : memref<512xf32, #tpu.memory_space<vmem>>) target_semaphore(%arg4 : memref<!tpu.dma_semaphore, #tpu.memory_space<semaphore_mem>>)
    } else {
    }
    %c1_i32 = arith.constant 1 : i32
    %6 = arith.addi %1, %c1_i32 : i32
    %c12_i32_1 = arith.constant 12 : i32
    %7 = arith.cmpi slt, %6, %c12_i32_1 : i32
    %8 = arith.extui %7 : i1 to i32
    %c0_i32_2 = arith.constant 0 : i32
    %9 = arith.cmpi ne, %8, %c0_i32_2 : i32
    scf.if %9 {
      %c1_i32_80 = arith.constant 1 : i32
      %130 = arith.addi %1, %c1_i32_80 : i32
      %131 = arith.index_cast %130 : i32 to index
      %132 = memref.load %arg1[%131] : memref<12xi32, #tpu.memory_space<smem>>
      %c1_i32_81 = arith.constant 1 : i32
      %c0_i32_82 = arith.constant 0 : i32
      %133 = tpu.memref_slice %arg2[%132, %c0_i32_82] : memref<32x512xf32, #tpu.memory_space<any>> -> memref<1x512xf32, #tpu.memory_space<any>>
      %134 = tpu.memref_squeeze %133 : memref<1x512xf32, #tpu.memory_space<any>> -> memref<512xf32, #tpu.memory_space<any>>
      %c0_i32_83 = arith.constant 0 : i32
      %135 = tpu.memref_slice %arg3[%c1_i32_81, %c0_i32_83] : memref<16x512xf32, #tpu.memory_space<vmem>> -> memref<1x512xf32, #tpu.memory_space<vmem>>
      %136 = tpu.memref_squeeze %135 : memref<1x512xf32, #tpu.memory_space<vmem>> -> memref<512xf32, #tpu.memory_space<vmem>>
      tpu.enqueue_dma source(%134 : memref<512xf32, #tpu.memory_space<any>>) target(%136 : memref<512xf32, #tpu.memory_space<vmem>>) target_semaphore(%arg4 : memref<!tpu.dma_semaphore, #tpu.memory_space<semaphore_mem>>)
    } else {
    }
    %c2_i32 = arith.constant 2 : i32
    %10 = arith.addi %1, %c2_i32 : i32
    %c12_i32_3 = arith.constant 12 : i32
    %11 = arith.cmpi slt, %10, %c12_i32_3 : i32
    %12 = arith.extui %11 : i1 to i32
    %c0_i32_4 = arith.constant 0 : i32
    %13 = arith.cmpi ne, %12, %c0_i32_4 : i32
    scf.if %13 {
      %c2_i32_80 = arith.constant 2 : i32
      %130 = arith.addi %1, %c2_i32_80 : i32
      %131 = arith.index_cast %130 : i32 to index
      %132 = memref.load %arg1[%131] : memref<12xi32, #tpu.memory_space<smem>>
      %c2_i32_81 = arith.constant 2 : i32
      %c0_i32_82 = arith.constant 0 : i32
      %133 = tpu.memref_slice %arg2[%132, %c0_i32_82] : memref<32x512xf32, #tpu.memory_space<any>> -> memref<1x512xf32, #tpu.memory_space<any>>
      %134 = tpu.memref_squeeze %133 : memref<1x512xf32, #tpu.memory_space<any>> -> memref<512xf32, #tpu.memory_space<any>>
      %c0_i32_83 = arith.constant 0 : i32
      %135 = tpu.memref_slice %arg3[%c2_i32_81, %c0_i32_83] : memref<16x512xf32, #tpu.memory_space<vmem>> -> memref<1x512xf32, #tpu.memory_space<vmem>>
      %136 = tpu.memref_squeeze %135 : memref<1x512xf32, #tpu.memory_space<vmem>> -> memref<512xf32, #tpu.memory_space<vmem>>
      tpu.enqueue_dma source(%134 : memref<512xf32, #tpu.memory_space<any>>) target(%136 : memref<512xf32, #tpu.memory_space<vmem>>) target_semaphore(%arg4 : memref<!tpu.dma_semaphore, #tpu.memory_space<semaphore_mem>>)
    } else {
    }
    %c3_i32 = arith.constant 3 : i32
    %14 = arith.addi %1, %c3_i32 : i32
    %c12_i32_5 = arith.constant 12 : i32
    %15 = arith.cmpi slt, %14, %c12_i32_5 : i32
    %16 = arith.extui %15 : i1 to i32
    %c0_i32_6 = arith.constant 0 : i32
    %17 = arith.cmpi ne, %16, %c0_i32_6 : i32
    scf.if %17 {
      %c3_i32_80 = arith.constant 3 : i32
      %130 = arith.addi %1, %c3_i32_80 : i32
      %131 = arith.index_cast %130 : i32 to index
      %132 = memref.load %arg1[%131] : memref<12xi32, #tpu.memory_space<smem>>
      %c3_i32_81 = arith.constant 3 : i32
      %c0_i32_82 = arith.constant 0 : i32
      %133 = tpu.memref_slice %arg2[%132, %c0_i32_82] : memref<32x512xf32, #tpu.memory_space<any>> -> memref<1x512xf32, #tpu.memory_space<any>>
      %134 = tpu.memref_squeeze %133 : memref<1x512xf32, #tpu.memory_space<any>> -> memref<512xf32, #tpu.memory_space<any>>
      %c0_i32_83 = arith.constant 0 : i32
      %135 = tpu.memref_slice %arg3[%c3_i32_81, %c0_i32_83] : memref<16x512xf32, #tpu.memory_space<vmem>> -> memref<1x512xf32, #tpu.memory_space<vmem>>
      %136 = tpu.memref_squeeze %135 : memref<1x512xf32, #tpu.memory_space<vmem>> -> memref<512xf32, #tpu.memory_space<vmem>>
      tpu.enqueue_dma source(%134 : memref<512xf32, #tpu.memory_space<any>>) target(%136 : memref<512xf32, #tpu.memory_space<vmem>>) target_semaphore(%arg4 : memref<!tpu.dma_semaphore, #tpu.memory_space<semaphore_mem>>)
    } else {
    }
    %c4_i32 = arith.constant 4 : i32
    %18 = arith.addi %1, %c4_i32 : i32
    %c12_i32_7 = arith.constant 12 : i32
    %19 = arith.cmpi slt, %18, %c12_i32_7 : i32
    %20 = arith.extui %19 : i1 to i32
    %c0_i32_8 = arith.constant 0 : i32
    %21 = arith.cmpi ne, %20, %c0_i32_8 : i32
    scf.if %21 {
      %c4_i32_80 = arith.constant 4 : i32
      %130 = arith.addi %1, %c4_i32_80 : i32
      %131 = arith.index_cast %130 : i32 to index
      %132 = memref.load %arg1[%131] : memref<12xi32, #tpu.memory_space<smem>>
      %c4_i32_81 = arith.constant 4 : i32
      %c0_i32_82 = arith.constant 0 : i32
      %133 = tpu.memref_slice %arg2[%132, %c0_i32_82] : memref<32x512xf32, #tpu.memory_space<any>> -> memref<1x512xf32, #tpu.memory_space<any>>
      %134 = tpu.memref_squeeze %133 : memref<1x512xf32, #tpu.memory_space<any>> -> memref<512xf32, #tpu.memory_space<any>>
      %c0_i32_83 = arith.constant 0 : i32
      %135 = tpu.memref_slice %arg3[%c4_i32_81, %c0_i32_83] : memref<16x512xf32, #tpu.memory_space<vmem>> -> memref<1x512xf32, #tpu.memory_space<vmem>>
      %136 = tpu.memref_squeeze %135 : memref<1x512xf32, #tpu.memory_space<vmem>> -> memref<512xf32, #tpu.memory_space<vmem>>
      tpu.enqueue_dma source(%134 : memref<512xf32, #tpu.memory_space<any>>) target(%136 : memref<512xf32, #tpu.memory_space<vmem>>) target_semaphore(%arg4 : memref<!tpu.dma_semaphore, #tpu.memory_space<semaphore_mem>>)
    } else {
    }
    %c5_i32 = arith.constant 5 : i32
    %22 = arith.addi %1, %c5_i32 : i32
    %c12_i32_9 = arith.constant 12 : i32
    %23 = arith.cmpi slt, %22, %c12_i32_9 : i32
    %24 = arith.extui %23 : i1 to i32
    %c0_i32_10 = arith.constant 0 : i32
    %25 = arith.cmpi ne, %24, %c0_i32_10 : i32
    scf.if %25 {
      %c5_i32_80 = arith.constant 5 : i32
      %130 = arith.addi %1, %c5_i32_80 : i32
      %131 = arith.index_cast %130 : i32 to index
      %132 = memref.load %arg1[%131] : memref<12xi32, #tpu.memory_space<smem>>
      %c5_i32_81 = arith.constant 5 : i32
      %c0_i32_82 = arith.constant 0 : i32
      %133 = tpu.memref_slice %arg2[%132, %c0_i32_82] : memref<32x512xf32, #tpu.memory_space<any>> -> memref<1x512xf32, #tpu.memory_space<any>>
      %134 = tpu.memref_squeeze %133 : memref<1x512xf32, #tpu.memory_space<any>> -> memref<512xf32, #tpu.memory_space<any>>
      %c0_i32_83 = arith.constant 0 : i32
      %135 = tpu.memref_slice %arg3[%c5_i32_81, %c0_i32_83] : memref<16x512xf32, #tpu.memory_space<vmem>> -> memref<1x512xf32, #tpu.memory_space<vmem>>
      %136 = tpu.memref_squeeze %135 : memref<1x512xf32, #tpu.memory_space<vmem>> -> memref<512xf32, #tpu.memory_space<vmem>>
      tpu.enqueue_dma source(%134 : memref<512xf32, #tpu.memory_space<any>>) target(%136 : memref<512xf32, #tpu.memory_space<vmem>>) target_semaphore(%arg4 : memref<!tpu.dma_semaphore, #tpu.memory_space<semaphore_mem>>)
    } else {
    }
    %c6_i32 = arith.constant 6 : i32
    %26 = arith.addi %1, %c6_i32 : i32
    %c12_i32_11 = arith.constant 12 : i32
    %27 = arith.cmpi slt, %26, %c12_i32_11 : i32
    %28 = arith.extui %27 : i1 to i32
    %c0_i32_12 = arith.constant 0 : i32
    %29 = arith.cmpi ne, %28, %c0_i32_12 : i32
    scf.if %29 {
      %c6_i32_80 = arith.constant 6 : i32
      %130 = arith.addi %1, %c6_i32_80 : i32
      %131 = arith.index_cast %130 : i32 to index
      %132 = memref.load %arg1[%131] : memref<12xi32, #tpu.memory_space<smem>>
      %c6_i32_81 = arith.constant 6 : i32
      %c0_i32_82 = arith.constant 0 : i32
      %133 = tpu.memref_slice %arg2[%132, %c0_i32_82] : memref<32x512xf32, #tpu.memory_space<any>> -> memref<1x512xf32, #tpu.memory_space<any>>
      %134 = tpu.memref_squeeze %133 : memref<1x512xf32, #tpu.memory_space<any>> -> memref<512xf32, #tpu.memory_space<any>>
      %c0_i32_83 = arith.constant 0 : i32
      %135 = tpu.memref_slice %arg3[%c6_i32_81, %c0_i32_83] : memref<16x512xf32, #tpu.memory_space<vmem>> -> memref<1x512xf32, #tpu.memory_space<vmem>>
      %136 = tpu.memref_squeeze %135 : memref<1x512xf32, #tpu.memory_space<vmem>> -> memref<512xf32, #tpu.memory_space<vmem>>
      tpu.enqueue_dma source(%134 : memref<512xf32, #tpu.memory_space<any>>) target(%136 : memref<512xf32, #tpu.memory_space<vmem>>) target_semaphore(%arg4 : memref<!tpu.dma_semaphore, #tpu.memory_space<semaphore_mem>>)
    } else {
    }
    %c7_i32 = arith.constant 7 : i32
    %30 = arith.addi %1, %c7_i32 : i32
    %c12_i32_13 = arith.constant 12 : i32
    %31 = arith.cmpi slt, %30, %c12_i32_13 : i32
    %32 = arith.extui %31 : i1 to i32
    %c0_i32_14 = arith.constant 0 : i32
    %33 = arith.cmpi ne, %32, %c0_i32_14 : i32
    scf.if %33 {
      %c7_i32_80 = arith.constant 7 : i32
      %130 = arith.addi %1, %c7_i32_80 : i32
      %131 = arith.index_cast %130 : i32 to index
      %132 = memref.load %arg1[%131] : memref<12xi32, #tpu.memory_space<smem>>
      %c7_i32_81 = arith.constant 7 : i32
      %c0_i32_82 = arith.constant 0 : i32
      %133 = tpu.memref_slice %arg2[%132, %c0_i32_82] : memref<32x512xf32, #tpu.memory_space<any>> -> memref<1x512xf32, #tpu.memory_space<any>>
      %134 = tpu.memref_squeeze %133 : memref<1x512xf32, #tpu.memory_space<any>> -> memref<512xf32, #tpu.memory_space<any>>
      %c0_i32_83 = arith.constant 0 : i32
      %135 = tpu.memref_slice %arg3[%c7_i32_81, %c0_i32_83] : memref<16x512xf32, #tpu.memory_space<vmem>> -> memref<1x512xf32, #tpu.memory_space<vmem>>
      %136 = tpu.memref_squeeze %135 : memref<1x512xf32, #tpu.memory_space<vmem>> -> memref<512xf32, #tpu.memory_space<vmem>>
      tpu.enqueue_dma source(%134 : memref<512xf32, #tpu.memory_space<any>>) target(%136 : memref<512xf32, #tpu.memory_space<vmem>>) target_semaphore(%arg4 : memref<!tpu.dma_semaphore, #tpu.memory_space<semaphore_mem>>)
    } else {
    }
    %c8_i32 = arith.constant 8 : i32
    %34 = arith.addi %1, %c8_i32 : i32
    %c12_i32_15 = arith.constant 12 : i32
    %35 = arith.cmpi slt, %34, %c12_i32_15 : i32
    %36 = arith.extui %35 : i1 to i32
    %c0_i32_16 = arith.constant 0 : i32
    %37 = arith.cmpi ne, %36, %c0_i32_16 : i32
    scf.if %37 {
      %c8_i32_80 = arith.constant 8 : i32
      %130 = arith.addi %1, %c8_i32_80 : i32
      %131 = arith.index_cast %130 : i32 to index
      %132 = memref.load %arg1[%131] : memref<12xi32, #tpu.memory_space<smem>>
      %c8_i32_81 = arith.constant 8 : i32
      %c0_i32_82 = arith.constant 0 : i32
      %133 = tpu.memref_slice %arg2[%132, %c0_i32_82] : memref<32x512xf32, #tpu.memory_space<any>> -> memref<1x512xf32, #tpu.memory_space<any>>
      %134 = tpu.memref_squeeze %133 : memref<1x512xf32, #tpu.memory_space<any>> -> memref<512xf32, #tpu.memory_space<any>>
      %c0_i32_83 = arith.constant 0 : i32
      %135 = tpu.memref_slice %arg3[%c8_i32_81, %c0_i32_83] : memref<16x512xf32, #tpu.memory_space<vmem>> -> memref<1x512xf32, #tpu.memory_space<vmem>>
      %136 = tpu.memref_squeeze %135 : memref<1x512xf32, #tpu.memory_space<vmem>> -> memref<512xf32, #tpu.memory_space<vmem>>
      tpu.enqueue_dma source(%134 : memref<512xf32, #tpu.memory_space<any>>) target(%136 : memref<512xf32, #tpu.memory_space<vmem>>) target_semaphore(%arg4 : memref<!tpu.dma_semaphore, #tpu.memory_space<semaphore_mem>>)
    } else {
    }
    %c9_i32 = arith.constant 9 : i32
    %38 = arith.addi %1, %c9_i32 : i32
    %c12_i32_17 = arith.constant 12 : i32
    %39 = arith.cmpi slt, %38, %c12_i32_17 : i32
    %40 = arith.extui %39 : i1 to i32
    %c0_i32_18 = arith.constant 0 : i32
    %41 = arith.cmpi ne, %40, %c0_i32_18 : i32
    scf.if %41 {
      %c9_i32_80 = arith.constant 9 : i32
      %130 = arith.addi %1, %c9_i32_80 : i32
      %131 = arith.index_cast %130 : i32 to index
      %132 = memref.load %arg1[%131] : memref<12xi32, #tpu.memory_space<smem>>
      %c9_i32_81 = arith.constant 9 : i32
      %c0_i32_82 = arith.constant 0 : i32
      %133 = tpu.memref_slice %arg2[%132, %c0_i32_82] : memref<32x512xf32, #tpu.memory_space<any>> -> memref<1x512xf32, #tpu.memory_space<any>>
      %134 = tpu.memref_squeeze %133 : memref<1x512xf32, #tpu.memory_space<any>> -> memref<512xf32, #tpu.memory_space<any>>
      %c0_i32_83 = arith.constant 0 : i32
      %135 = tpu.memref_slice %arg3[%c9_i32_81, %c0_i32_83] : memref<16x512xf32, #tpu.memory_space<vmem>> -> memref<1x512xf32, #tpu.memory_space<vmem>>
      %136 = tpu.memref_squeeze %135 : memref<1x512xf32, #tpu.memory_space<vmem>> -> memref<512xf32, #tpu.memory_space<vmem>>
      tpu.enqueue_dma source(%134 : memref<512xf32, #tpu.memory_space<any>>) target(%136 : memref<512xf32, #tpu.memory_space<vmem>>) target_semaphore(%arg4 : memref<!tpu.dma_semaphore, #tpu.memory_space<semaphore_mem>>)
    } else {
    }
    %c10_i32 = arith.constant 10 : i32
    %42 = arith.addi %1, %c10_i32 : i32
    %c12_i32_19 = arith.constant 12 : i32
    %43 = arith.cmpi slt, %42, %c12_i32_19 : i32
    %44 = arith.extui %43 : i1 to i32
    %c0_i32_20 = arith.constant 0 : i32
    %45 = arith.cmpi ne, %44, %c0_i32_20 : i32
    scf.if %45 {
      %c10_i32_80 = arith.constant 10 : i32
      %130 = arith.addi %1, %c10_i32_80 : i32
      %131 = arith.index_cast %130 : i32 to index
      %132 = memref.load %arg1[%131] : memref<12xi32, #tpu.memory_space<smem>>
      %c10_i32_81 = arith.constant 10 : i32
      %c0_i32_82 = arith.constant 0 : i32
      %133 = tpu.memref_slice %arg2[%132, %c0_i32_82] : memref<32x512xf32, #tpu.memory_space<any>> -> memref<1x512xf32, #tpu.memory_space<any>>
      %134 = tpu.memref_squeeze %133 : memref<1x512xf32, #tpu.memory_space<any>> -> memref<512xf32, #tpu.memory_space<any>>
      %c0_i32_83 = arith.constant 0 : i32
      %135 = tpu.memref_slice %arg3[%c10_i32_81, %c0_i32_83] : memref<16x512xf32, #tpu.memory_space<vmem>> -> memref<1x512xf32, #tpu.memory_space<vmem>>
      %136 = tpu.memref_squeeze %135 : memref<1x512xf32, #tpu.memory_space<vmem>> -> memref<512xf32, #tpu.memory_space<vmem>>
      tpu.enqueue_dma source(%134 : memref<512xf32, #tpu.memory_space<any>>) target(%136 : memref<512xf32, #tpu.memory_space<vmem>>) target_semaphore(%arg4 : memref<!tpu.dma_semaphore, #tpu.memory_space<semaphore_mem>>)
    } else {
    }
    %c11_i32 = arith.constant 11 : i32
    %46 = arith.addi %1, %c11_i32 : i32
    %c12_i32_21 = arith.constant 12 : i32
    %47 = arith.cmpi slt, %46, %c12_i32_21 : i32
    %48 = arith.extui %47 : i1 to i32
    %c0_i32_22 = arith.constant 0 : i32
    %49 = arith.cmpi ne, %48, %c0_i32_22 : i32
    scf.if %49 {
      %c11_i32_80 = arith.constant 11 : i32
      %130 = arith.addi %1, %c11_i32_80 : i32
      %131 = arith.index_cast %130 : i32 to index
      %132 = memref.load %arg1[%131] : memref<12xi32, #tpu.memory_space<smem>>
      %c11_i32_81 = arith.constant 11 : i32
      %c0_i32_82 = arith.constant 0 : i32
      %133 = tpu.memref_slice %arg2[%132, %c0_i32_82] : memref<32x512xf32, #tpu.memory_space<any>> -> memref<1x512xf32, #tpu.memory_space<any>>
      %134 = tpu.memref_squeeze %133 : memref<1x512xf32, #tpu.memory_space<any>> -> memref<512xf32, #tpu.memory_space<any>>
      %c0_i32_83 = arith.constant 0 : i32
      %135 = tpu.memref_slice %arg3[%c11_i32_81, %c0_i32_83] : memref<16x512xf32, #tpu.memory_space<vmem>> -> memref<1x512xf32, #tpu.memory_space<vmem>>
      %136 = tpu.memref_squeeze %135 : memref<1x512xf32, #tpu.memory_space<vmem>> -> memref<512xf32, #tpu.memory_space<vmem>>
      tpu.enqueue_dma source(%134 : memref<512xf32, #tpu.memory_space<any>>) target(%136 : memref<512xf32, #tpu.memory_space<vmem>>) target_semaphore(%arg4 : memref<!tpu.dma_semaphore, #tpu.memory_space<semaphore_mem>>)
    } else {
    }
    %c12_i32_23 = arith.constant 12 : i32
    %50 = arith.addi %1, %c12_i32_23 : i32
    %c12_i32_24 = arith.constant 12 : i32
    %51 = arith.cmpi slt, %50, %c12_i32_24 : i32
    %52 = arith.extui %51 : i1 to i32
    %c0_i32_25 = arith.constant 0 : i32
    %53 = arith.cmpi ne, %52, %c0_i32_25 : i32
    scf.if %53 {
      %c12_i32_80 = arith.constant 12 : i32
      %130 = arith.addi %1, %c12_i32_80 : i32
      %131 = arith.index_cast %130 : i32 to index
      %132 = memref.load %arg1[%131] : memref<12xi32, #tpu.memory_space<smem>>
      %c12_i32_81 = arith.constant 12 : i32
      %c0_i32_82 = arith.constant 0 : i32
      %133 = tpu.memref_slice %arg2[%132, %c0_i32_82] : memref<32x512xf32, #tpu.memory_space<any>> -> memref<1x512xf32, #tpu.memory_space<any>>
      %134 = tpu.memref_squeeze %133 : memref<1x512xf32, #tpu.memory_space<any>> -> memref<512xf32, #tpu.memory_space<any>>
      %c0_i32_83 = arith.constant 0 : i32
      %135 = tpu.memref_slice %arg3[%c12_i32_81, %c0_i32_83] : memref<16x512xf32, #tpu.memory_space<vmem>> -> memref<1x512xf32, #tpu.memory_space<vmem>>
      %136 = tpu.memref_squeeze %135 : memref<1x512xf32, #tpu.memory_space<vmem>> -> memref<512xf32, #tpu.memory_space<vmem>>
      tpu.enqueue_dma source(%134 : memref<512xf32, #tpu.memory_space<any>>) target(%136 : memref<512xf32, #tpu.memory_space<vmem>>) target_semaphore(%arg4 : memref<!tpu.dma_semaphore, #tpu.memory_space<semaphore_mem>>)
    } else {
    }
    %c13_i32 = arith.constant 13 : i32
    %54 = arith.addi %1, %c13_i32 : i32
    %c12_i32_26 = arith.constant 12 : i32
    %55 = arith.cmpi slt, %54, %c12_i32_26 : i32
    %56 = arith.extui %55 : i1 to i32
    %c0_i32_27 = arith.constant 0 : i32
    %57 = arith.cmpi ne, %56, %c0_i32_27 : i32
    scf.if %57 {
      %c13_i32_80 = arith.constant 13 : i32
      %130 = arith.addi %1, %c13_i32_80 : i32
      %131 = arith.index_cast %130 : i32 to index
      %132 = memref.load %arg1[%131] : memref<12xi32, #tpu.memory_space<smem>>
      %c13_i32_81 = arith.constant 13 : i32
      %c0_i32_82 = arith.constant 0 : i32
      %133 = tpu.memref_slice %arg2[%132, %c0_i32_82] : memref<32x512xf32, #tpu.memory_space<any>> -> memref<1x512xf32, #tpu.memory_space<any>>
      %134 = tpu.memref_squeeze %133 : memref<1x512xf32, #tpu.memory_space<any>> -> memref<512xf32, #tpu.memory_space<any>>
      %c0_i32_83 = arith.constant 0 : i32
      %135 = tpu.memref_slice %arg3[%c13_i32_81, %c0_i32_83] : memref<16x512xf32, #tpu.memory_space<vmem>> -> memref<1x512xf32, #tpu.memory_space<vmem>>
      %136 = tpu.memref_squeeze %135 : memref<1x512xf32, #tpu.memory_space<vmem>> -> memref<512xf32, #tpu.memory_space<vmem>>
      tpu.enqueue_dma source(%134 : memref<512xf32, #tpu.memory_space<any>>) target(%136 : memref<512xf32, #tpu.memory_space<vmem>>) target_semaphore(%arg4 : memref<!tpu.dma_semaphore, #tpu.memory_space<semaphore_mem>>)
    } else {
    }
    %c14_i32 = arith.constant 14 : i32
    %58 = arith.addi %1, %c14_i32 : i32
    %c12_i32_28 = arith.constant 12 : i32
    %59 = arith.cmpi slt, %58, %c12_i32_28 : i32
    %60 = arith.extui %59 : i1 to i32
    %c0_i32_29 = arith.constant 0 : i32
    %61 = arith.cmpi ne, %60, %c0_i32_29 : i32
    scf.if %61 {
      %c14_i32_80 = arith.constant 14 : i32
      %130 = arith.addi %1, %c14_i32_80 : i32
      %131 = arith.index_cast %130 : i32 to index
      %132 = memref.load %arg1[%131] : memref<12xi32, #tpu.memory_space<smem>>
      %c14_i32_81 = arith.constant 14 : i32
      %c0_i32_82 = arith.constant 0 : i32
      %133 = tpu.memref_slice %arg2[%132, %c0_i32_82] : memref<32x512xf32, #tpu.memory_space<any>> -> memref<1x512xf32, #tpu.memory_space<any>>
      %134 = tpu.memref_squeeze %133 : memref<1x512xf32, #tpu.memory_space<any>> -> memref<512xf32, #tpu.memory_space<any>>
      %c0_i32_83 = arith.constant 0 : i32
      %135 = tpu.memref_slice %arg3[%c14_i32_81, %c0_i32_83] : memref<16x512xf32, #tpu.memory_space<vmem>> -> memref<1x512xf32, #tpu.memory_space<vmem>>
      %136 = tpu.memref_squeeze %135 : memref<1x512xf32, #tpu.memory_space<vmem>> -> memref<512xf32, #tpu.memory_space<vmem>>
      tpu.enqueue_dma source(%134 : memref<512xf32, #tpu.memory_space<any>>) target(%136 : memref<512xf32, #tpu.memory_space<vmem>>) target_semaphore(%arg4 : memref<!tpu.dma_semaphore, #tpu.memory_space<semaphore_mem>>)
    } else {
    }
    %c15_i32 = arith.constant 15 : i32
    %62 = arith.addi %1, %c15_i32 : i32
    %c12_i32_30 = arith.constant 12 : i32
    %63 = arith.cmpi slt, %62, %c12_i32_30 : i32
    %64 = arith.extui %63 : i1 to i32
    %c0_i32_31 = arith.constant 0 : i32
    %65 = arith.cmpi ne, %64, %c0_i32_31 : i32
    scf.if %65 {
      %c15_i32_80 = arith.constant 15 : i32
      %130 = arith.addi %1, %c15_i32_80 : i32
      %131 = arith.index_cast %130 : i32 to index
      %132 = memref.load %arg1[%131] : memref<12xi32, #tpu.memory_space<smem>>
      %c15_i32_81 = arith.constant 15 : i32
      %c0_i32_82 = arith.constant 0 : i32
      %133 = tpu.memref_slice %arg2[%132, %c0_i32_82] : memref<32x512xf32, #tpu.memory_space<any>> -> memref<1x512xf32, #tpu.memory_space<any>>
      %134 = tpu.memref_squeeze %133 : memref<1x512xf32, #tpu.memory_space<any>> -> memref<512xf32, #tpu.memory_space<any>>
      %c0_i32_83 = arith.constant 0 : i32
      %135 = tpu.memref_slice %arg3[%c15_i32_81, %c0_i32_83] : memref<16x512xf32, #tpu.memory_space<vmem>> -> memref<1x512xf32, #tpu.memory_space<vmem>>
      %136 = tpu.memref_squeeze %135 : memref<1x512xf32, #tpu.memory_space<vmem>> -> memref<512xf32, #tpu.memory_space<vmem>>
      tpu.enqueue_dma source(%134 : memref<512xf32, #tpu.memory_space<any>>) target(%136 : memref<512xf32, #tpu.memory_space<vmem>>) target_semaphore(%arg4 : memref<!tpu.dma_semaphore, #tpu.memory_space<semaphore_mem>>)
    } else {
    }
    %c0_i32_32 = arith.constant 0 : i32
    %66 = arith.addi %1, %c0_i32_32 : i32
    %c12_i32_33 = arith.constant 12 : i32
    %67 = arith.cmpi slt, %66, %c12_i32_33 : i32
    %68 = arith.extui %67 : i1 to i32
    %c0_i32_34 = arith.constant 0 : i32
    %69 = arith.cmpi ne, %68, %c0_i32_34 : i32
    scf.if %69 {
      %c0_i32_80 = arith.constant 0 : i32
      %c0_i32_81 = arith.constant 0 : i32
      %c0_i32_82 = arith.constant 0 : i32
      %130 = tpu.memref_slice %arg2[%c0_i32_80, %c0_i32_82] : memref<32x512xf32, #tpu.memory_space<any>> -> memref<1x512xf32, #tpu.memory_space<any>>
      %131 = tpu.memref_squeeze %130 : memref<1x512xf32, #tpu.memory_space<any>> -> memref<512xf32, #tpu.memory_space<any>>
      %c0_i32_83 = arith.constant 0 : i32
      %132 = tpu.memref_slice %arg3[%c0_i32_81, %c0_i32_83] : memref<16x512xf32, #tpu.memory_space<vmem>> -> memref<1x512xf32, #tpu.memory_space<vmem>>
      %133 = tpu.memref_squeeze %132 : memref<1x512xf32, #tpu.memory_space<vmem>> -> memref<512xf32, #tpu.memory_space<vmem>>
      tpu.wait_dma2 semaphore(%arg4 : memref<!tpu.dma_semaphore, #tpu.memory_space<semaphore_mem>>) src(%131 : memref<512xf32, #tpu.memory_space<any>>) dst(%133 : memref<512xf32, #tpu.memory_space<vmem>>)
    } else {
    }
    %c1_i32_35 = arith.constant 1 : i32
    %70 = arith.addi %1, %c1_i32_35 : i32
    %c12_i32_36 = arith.constant 12 : i32
    %71 = arith.cmpi slt, %70, %c12_i32_36 : i32
    %72 = arith.extui %71 : i1 to i32
    %c0_i32_37 = arith.constant 0 : i32
    %73 = arith.cmpi ne, %72, %c0_i32_37 : i32
    scf.if %73 {
      %c0_i32_80 = arith.constant 0 : i32
      %c1_i32_81 = arith.constant 1 : i32
      %c0_i32_82 = arith.constant 0 : i32
      %130 = tpu.memref_slice %arg2[%c0_i32_80, %c0_i32_82] : memref<32x512xf32, #tpu.memory_space<any>> -> memref<1x512xf32, #tpu.memory_space<any>>
      %131 = tpu.memref_squeeze %130 : memref<1x512xf32, #tpu.memory_space<any>> -> memref<512xf32, #tpu.memory_space<any>>
      %c0_i32_83 = arith.constant 0 : i32
      %132 = tpu.memref_slice %arg3[%c1_i32_81, %c0_i32_83] : memref<16x512xf32, #tpu.memory_space<vmem>> -> memref<1x512xf32, #tpu.memory_space<vmem>>
      %133 = tpu.memref_squeeze %132 : memref<1x512xf32, #tpu.memory_space<vmem>> -> memref<512xf32, #tpu.memory_space<vmem>>
      tpu.wait_dma2 semaphore(%arg4 : memref<!tpu.dma_semaphore, #tpu.memory_space<semaphore_mem>>) src(%131 : memref<512xf32, #tpu.memory_space<any>>) dst(%133 : memref<512xf32, #tpu.memory_space<vmem>>)
    } else {
    }
    %c2_i32_38 = arith.constant 2 : i32
    %74 = arith.addi %1, %c2_i32_38 : i32
    %c12_i32_39 = arith.constant 12 : i32
    %75 = arith.cmpi slt, %74, %c12_i32_39 : i32
    %76 = arith.extui %75 : i1 to i32
    %c0_i32_40 = arith.constant 0 : i32
    %77 = arith.cmpi ne, %76, %c0_i32_40 : i32
    scf.if %77 {
      %c0_i32_80 = arith.constant 0 : i32
      %c2_i32_81 = arith.constant 2 : i32
      %c0_i32_82 = arith.constant 0 : i32
      %130 = tpu.memref_slice %arg2[%c0_i32_80, %c0_i32_82] : memref<32x512xf32, #tpu.memory_space<any>> -> memref<1x512xf32, #tpu.memory_space<any>>
      %131 = tpu.memref_squeeze %130 : memref<1x512xf32, #tpu.memory_space<any>> -> memref<512xf32, #tpu.memory_space<any>>
      %c0_i32_83 = arith.constant 0 : i32
      %132 = tpu.memref_slice %arg3[%c2_i32_81, %c0_i32_83] : memref<16x512xf32, #tpu.memory_space<vmem>> -> memref<1x512xf32, #tpu.memory_space<vmem>>
      %133 = tpu.memref_squeeze %132 : memref<1x512xf32, #tpu.memory_space<vmem>> -> memref<512xf32, #tpu.memory_space<vmem>>
      tpu.wait_dma2 semaphore(%arg4 : memref<!tpu.dma_semaphore, #tpu.memory_space<semaphore_mem>>) src(%131 : memref<512xf32, #tpu.memory_space<any>>) dst(%133 : memref<512xf32, #tpu.memory_space<vmem>>)
    } else {
    }
    %c3_i32_41 = arith.constant 3 : i32
    %78 = arith.addi %1, %c3_i32_41 : i32
    %c12_i32_42 = arith.constant 12 : i32
    %79 = arith.cmpi slt, %78, %c12_i32_42 : i32
    %80 = arith.extui %79 : i1 to i32
    %c0_i32_43 = arith.constant 0 : i32
    %81 = arith.cmpi ne, %80, %c0_i32_43 : i32
    scf.if %81 {
      %c0_i32_80 = arith.constant 0 : i32
      %c3_i32_81 = arith.constant 3 : i32
      %c0_i32_82 = arith.constant 0 : i32
      %130 = tpu.memref_slice %arg2[%c0_i32_80, %c0_i32_82] : memref<32x512xf32, #tpu.memory_space<any>> -> memref<1x512xf32, #tpu.memory_space<any>>
      %131 = tpu.memref_squeeze %130 : memref<1x512xf32, #tpu.memory_space<any>> -> memref<512xf32, #tpu.memory_space<any>>
      %c0_i32_83 = arith.constant 0 : i32
      %132 = tpu.memref_slice %arg3[%c3_i32_81, %c0_i32_83] : memref<16x512xf32, #tpu.memory_space<vmem>> -> memref<1x512xf32, #tpu.memory_space<vmem>>
      %133 = tpu.memref_squeeze %132 : memref<1x512xf32, #tpu.memory_space<vmem>> -> memref<512xf32, #tpu.memory_space<vmem>>
      tpu.wait_dma2 semaphore(%arg4 : memref<!tpu.dma_semaphore, #tpu.memory_space<semaphore_mem>>) src(%131 : memref<512xf32, #tpu.memory_space<any>>) dst(%133 : memref<512xf32, #tpu.memory_space<vmem>>)
    } else {
    }
    %c4_i32_44 = arith.constant 4 : i32
    %82 = arith.addi %1, %c4_i32_44 : i32
    %c12_i32_45 = arith.constant 12 : i32
    %83 = arith.cmpi slt, %82, %c12_i32_45 : i32
    %84 = arith.extui %83 : i1 to i32
    %c0_i32_46 = arith.constant 0 : i32
    %85 = arith.cmpi ne, %84, %c0_i32_46 : i32
    scf.if %85 {
      %c0_i32_80 = arith.constant 0 : i32
      %c4_i32_81 = arith.constant 4 : i32
      %c0_i32_82 = arith.constant 0 : i32
      %130 = tpu.memref_slice %arg2[%c0_i32_80, %c0_i32_82] : memref<32x512xf32, #tpu.memory_space<any>> -> memref<1x512xf32, #tpu.memory_space<any>>
      %131 = tpu.memref_squeeze %130 : memref<1x512xf32, #tpu.memory_space<any>> -> memref<512xf32, #tpu.memory_space<any>>
      %c0_i32_83 = arith.constant 0 : i32
      %132 = tpu.memref_slice %arg3[%c4_i32_81, %c0_i32_83] : memref<16x512xf32, #tpu.memory_space<vmem>> -> memref<1x512xf32, #tpu.memory_space<vmem>>
      %133 = tpu.memref_squeeze %132 : memref<1x512xf32, #tpu.memory_space<vmem>> -> memref<512xf32, #tpu.memory_space<vmem>>
      tpu.wait_dma2 semaphore(%arg4 : memref<!tpu.dma_semaphore, #tpu.memory_space<semaphore_mem>>) src(%131 : memref<512xf32, #tpu.memory_space<any>>) dst(%133 : memref<512xf32, #tpu.memory_space<vmem>>)
    } else {
    }
    %c5_i32_47 = arith.constant 5 : i32
    %86 = arith.addi %1, %c5_i32_47 : i32
    %c12_i32_48 = arith.constant 12 : i32
    %87 = arith.cmpi slt, %86, %c12_i32_48 : i32
    %88 = arith.extui %87 : i1 to i32
    %c0_i32_49 = arith.constant 0 : i32
    %89 = arith.cmpi ne, %88, %c0_i32_49 : i32
    scf.if %89 {
      %c0_i32_80 = arith.constant 0 : i32
      %c5_i32_81 = arith.constant 5 : i32
      %c0_i32_82 = arith.constant 0 : i32
      %130 = tpu.memref_slice %arg2[%c0_i32_80, %c0_i32_82] : memref<32x512xf32, #tpu.memory_space<any>> -> memref<1x512xf32, #tpu.memory_space<any>>
      %131 = tpu.memref_squeeze %130 : memref<1x512xf32, #tpu.memory_space<any>> -> memref<512xf32, #tpu.memory_space<any>>
      %c0_i32_83 = arith.constant 0 : i32
      %132 = tpu.memref_slice %arg3[%c5_i32_81, %c0_i32_83] : memref<16x512xf32, #tpu.memory_space<vmem>> -> memref<1x512xf32, #tpu.memory_space<vmem>>
      %133 = tpu.memref_squeeze %132 : memref<1x512xf32, #tpu.memory_space<vmem>> -> memref<512xf32, #tpu.memory_space<vmem>>
      tpu.wait_dma2 semaphore(%arg4 : memref<!tpu.dma_semaphore, #tpu.memory_space<semaphore_mem>>) src(%131 : memref<512xf32, #tpu.memory_space<any>>) dst(%133 : memref<512xf32, #tpu.memory_space<vmem>>)
    } else {
    }
    %c6_i32_50 = arith.constant 6 : i32
    %90 = arith.addi %1, %c6_i32_50 : i32
    %c12_i32_51 = arith.constant 12 : i32
    %91 = arith.cmpi slt, %90, %c12_i32_51 : i32
    %92 = arith.extui %91 : i1 to i32
    %c0_i32_52 = arith.constant 0 : i32
    %93 = arith.cmpi ne, %92, %c0_i32_52 : i32
    scf.if %93 {
      %c0_i32_80 = arith.constant 0 : i32
      %c6_i32_81 = arith.constant 6 : i32
      %c0_i32_82 = arith.constant 0 : i32
      %130 = tpu.memref_slice %arg2[%c0_i32_80, %c0_i32_82] : memref<32x512xf32, #tpu.memory_space<any>> -> memref<1x512xf32, #tpu.memory_space<any>>
      %131 = tpu.memref_squeeze %130 : memref<1x512xf32, #tpu.memory_space<any>> -> memref<512xf32, #tpu.memory_space<any>>
      %c0_i32_83 = arith.constant 0 : i32
      %132 = tpu.memref_slice %arg3[%c6_i32_81, %c0_i32_83] : memref<16x512xf32, #tpu.memory_space<vmem>> -> memref<1x512xf32, #tpu.memory_space<vmem>>
      %133 = tpu.memref_squeeze %132 : memref<1x512xf32, #tpu.memory_space<vmem>> -> memref<512xf32, #tpu.memory_space<vmem>>
      tpu.wait_dma2 semaphore(%arg4 : memref<!tpu.dma_semaphore, #tpu.memory_space<semaphore_mem>>) src(%131 : memref<512xf32, #tpu.memory_space<any>>) dst(%133 : memref<512xf32, #tpu.memory_space<vmem>>)
    } else {
    }
    %c7_i32_53 = arith.constant 7 : i32
    %94 = arith.addi %1, %c7_i32_53 : i32
    %c12_i32_54 = arith.constant 12 : i32
    %95 = arith.cmpi slt, %94, %c12_i32_54 : i32
    %96 = arith.extui %95 : i1 to i32
    %c0_i32_55 = arith.constant 0 : i32
    %97 = arith.cmpi ne, %96, %c0_i32_55 : i32
    scf.if %97 {
      %c0_i32_80 = arith.constant 0 : i32
      %c7_i32_81 = arith.constant 7 : i32
      %c0_i32_82 = arith.constant 0 : i32
      %130 = tpu.memref_slice %arg2[%c0_i32_80, %c0_i32_82] : memref<32x512xf32, #tpu.memory_space<any>> -> memref<1x512xf32, #tpu.memory_space<any>>
      %131 = tpu.memref_squeeze %130 : memref<1x512xf32, #tpu.memory_space<any>> -> memref<512xf32, #tpu.memory_space<any>>
      %c0_i32_83 = arith.constant 0 : i32
      %132 = tpu.memref_slice %arg3[%c7_i32_81, %c0_i32_83] : memref<16x512xf32, #tpu.memory_space<vmem>> -> memref<1x512xf32, #tpu.memory_space<vmem>>
      %133 = tpu.memref_squeeze %132 : memref<1x512xf32, #tpu.memory_space<vmem>> -> memref<512xf32, #tpu.memory_space<vmem>>
      tpu.wait_dma2 semaphore(%arg4 : memref<!tpu.dma_semaphore, #tpu.memory_space<semaphore_mem>>) src(%131 : memref<512xf32, #tpu.memory_space<any>>) dst(%133 : memref<512xf32, #tpu.memory_space<vmem>>)
    } else {
    }
    %c8_i32_56 = arith.constant 8 : i32
    %98 = arith.addi %1, %c8_i32_56 : i32
    %c12_i32_57 = arith.constant 12 : i32
    %99 = arith.cmpi slt, %98, %c12_i32_57 : i32
    %100 = arith.extui %99 : i1 to i32
    %c0_i32_58 = arith.constant 0 : i32
    %101 = arith.cmpi ne, %100, %c0_i32_58 : i32
    scf.if %101 {
      %c0_i32_80 = arith.constant 0 : i32
      %c8_i32_81 = arith.constant 8 : i32
      %c0_i32_82 = arith.constant 0 : i32
      %130 = tpu.memref_slice %arg2[%c0_i32_80, %c0_i32_82] : memref<32x512xf32, #tpu.memory_space<any>> -> memref<1x512xf32, #tpu.memory_space<any>>
      %131 = tpu.memref_squeeze %130 : memref<1x512xf32, #tpu.memory_space<any>> -> memref<512xf32, #tpu.memory_space<any>>
      %c0_i32_83 = arith.constant 0 : i32
      %132 = tpu.memref_slice %arg3[%c8_i32_81, %c0_i32_83] : memref<16x512xf32, #tpu.memory_space<vmem>> -> memref<1x512xf32, #tpu.memory_space<vmem>>
      %133 = tpu.memref_squeeze %132 : memref<1x512xf32, #tpu.memory_space<vmem>> -> memref<512xf32, #tpu.memory_space<vmem>>
      tpu.wait_dma2 semaphore(%arg4 : memref<!tpu.dma_semaphore, #tpu.memory_space<semaphore_mem>>) src(%131 : memref<512xf32, #tpu.memory_space<any>>) dst(%133 : memref<512xf32, #tpu.memory_space<vmem>>)
    } else {
    }
    %c9_i32_59 = arith.constant 9 : i32
    %102 = arith.addi %1, %c9_i32_59 : i32
    %c12_i32_60 = arith.constant 12 : i32
    %103 = arith.cmpi slt, %102, %c12_i32_60 : i32
    %104 = arith.extui %103 : i1 to i32
    %c0_i32_61 = arith.constant 0 : i32
    %105 = arith.cmpi ne, %104, %c0_i32_61 : i32
    scf.if %105 {
      %c0_i32_80 = arith.constant 0 : i32
      %c9_i32_81 = arith.constant 9 : i32
      %c0_i32_82 = arith.constant 0 : i32
      %130 = tpu.memref_slice %arg2[%c0_i32_80, %c0_i32_82] : memref<32x512xf32, #tpu.memory_space<any>> -> memref<1x512xf32, #tpu.memory_space<any>>
      %131 = tpu.memref_squeeze %130 : memref<1x512xf32, #tpu.memory_space<any>> -> memref<512xf32, #tpu.memory_space<any>>
      %c0_i32_83 = arith.constant 0 : i32
      %132 = tpu.memref_slice %arg3[%c9_i32_81, %c0_i32_83] : memref<16x512xf32, #tpu.memory_space<vmem>> -> memref<1x512xf32, #tpu.memory_space<vmem>>
      %133 = tpu.memref_squeeze %132 : memref<1x512xf32, #tpu.memory_space<vmem>> -> memref<512xf32, #tpu.memory_space<vmem>>
      tpu.wait_dma2 semaphore(%arg4 : memref<!tpu.dma_semaphore, #tpu.memory_space<semaphore_mem>>) src(%131 : memref<512xf32, #tpu.memory_space<any>>) dst(%133 : memref<512xf32, #tpu.memory_space<vmem>>)
    } else {
    }
    %c10_i32_62 = arith.constant 10 : i32
    %106 = arith.addi %1, %c10_i32_62 : i32
    %c12_i32_63 = arith.constant 12 : i32
    %107 = arith.cmpi slt, %106, %c12_i32_63 : i32
    %108 = arith.extui %107 : i1 to i32
    %c0_i32_64 = arith.constant 0 : i32
    %109 = arith.cmpi ne, %108, %c0_i32_64 : i32
    scf.if %109 {
      %c0_i32_80 = arith.constant 0 : i32
      %c10_i32_81 = arith.constant 10 : i32
      %c0_i32_82 = arith.constant 0 : i32
      %130 = tpu.memref_slice %arg2[%c0_i32_80, %c0_i32_82] : memref<32x512xf32, #tpu.memory_space<any>> -> memref<1x512xf32, #tpu.memory_space<any>>
      %131 = tpu.memref_squeeze %130 : memref<1x512xf32, #tpu.memory_space<any>> -> memref<512xf32, #tpu.memory_space<any>>
      %c0_i32_83 = arith.constant 0 : i32
      %132 = tpu.memref_slice %arg3[%c10_i32_81, %c0_i32_83] : memref<16x512xf32, #tpu.memory_space<vmem>> -> memref<1x512xf32, #tpu.memory_space<vmem>>
      %133 = tpu.memref_squeeze %132 : memref<1x512xf32, #tpu.memory_space<vmem>> -> memref<512xf32, #tpu.memory_space<vmem>>
      tpu.wait_dma2 semaphore(%arg4 : memref<!tpu.dma_semaphore, #tpu.memory_space<semaphore_mem>>) src(%131 : memref<512xf32, #tpu.memory_space<any>>) dst(%133 : memref<512xf32, #tpu.memory_space<vmem>>)
    } else {
    }
    %c11_i32_65 = arith.constant 11 : i32
    %110 = arith.addi %1, %c11_i32_65 : i32
    %c12_i32_66 = arith.constant 12 : i32
    %111 = arith.cmpi slt, %110, %c12_i32_66 : i32
    %112 = arith.extui %111 : i1 to i32
    %c0_i32_67 = arith.constant 0 : i32
    %113 = arith.cmpi ne, %112, %c0_i32_67 : i32
    scf.if %113 {
      %c0_i32_80 = arith.constant 0 : i32
      %c11_i32_81 = arith.constant 11 : i32
      %c0_i32_82 = arith.constant 0 : i32
      %130 = tpu.memref_slice %arg2[%c0_i32_80, %c0_i32_82] : memref<32x512xf32, #tpu.memory_space<any>> -> memref<1x512xf32, #tpu.memory_space<any>>
      %131 = tpu.memref_squeeze %130 : memref<1x512xf32, #tpu.memory_space<any>> -> memref<512xf32, #tpu.memory_space<any>>
      %c0_i32_83 = arith.constant 0 : i32
      %132 = tpu.memref_slice %arg3[%c11_i32_81, %c0_i32_83] : memref<16x512xf32, #tpu.memory_space<vmem>> -> memref<1x512xf32, #tpu.memory_space<vmem>>
      %133 = tpu.memref_squeeze %132 : memref<1x512xf32, #tpu.memory_space<vmem>> -> memref<512xf32, #tpu.memory_space<vmem>>
      tpu.wait_dma2 semaphore(%arg4 : memref<!tpu.dma_semaphore, #tpu.memory_space<semaphore_mem>>) src(%131 : memref<512xf32, #tpu.memory_space<any>>) dst(%133 : memref<512xf32, #tpu.memory_space<vmem>>)
    } else {
    }
    %c12_i32_68 = arith.constant 12 : i32
    %114 = arith.addi %1, %c12_i32_68 : i32
    %c12_i32_69 = arith.constant 12 : i32
    %115 = arith.cmpi slt, %114, %c12_i32_69 : i32
    %116 = arith.extui %115 : i1 to i32
    %c0_i32_70 = arith.constant 0 : i32
    %117 = arith.cmpi ne, %116, %c0_i32_70 : i32
    scf.if %117 {
      %c0_i32_80 = arith.constant 0 : i32
      %c12_i32_81 = arith.constant 12 : i32
      %c0_i32_82 = arith.constant 0 : i32
      %130 = tpu.memref_slice %arg2[%c0_i32_80, %c0_i32_82] : memref<32x512xf32, #tpu.memory_space<any>> -> memref<1x512xf32, #tpu.memory_space<any>>
      %131 = tpu.memref_squeeze %130 : memref<1x512xf32, #tpu.memory_space<any>> -> memref<512xf32, #tpu.memory_space<any>>
      %c0_i32_83 = arith.constant 0 : i32
      %132 = tpu.memref_slice %arg3[%c12_i32_81, %c0_i32_83] : memref<16x512xf32, #tpu.memory_space<vmem>> -> memref<1x512xf32, #tpu.memory_space<vmem>>
      %133 = tpu.memref_squeeze %132 : memref<1x512xf32, #tpu.memory_space<vmem>> -> memref<512xf32, #tpu.memory_space<vmem>>
      tpu.wait_dma2 semaphore(%arg4 : memref<!tpu.dma_semaphore, #tpu.memory_space<semaphore_mem>>) src(%131 : memref<512xf32, #tpu.memory_space<any>>) dst(%133 : memref<512xf32, #tpu.memory_space<vmem>>)
    } else {
    }
    %c13_i32_71 = arith.constant 13 : i32
    %118 = arith.addi %1, %c13_i32_71 : i32
    %c12_i32_72 = arith.constant 12 : i32
    %119 = arith.cmpi slt, %118, %c12_i32_72 : i32
    %120 = arith.extui %119 : i1 to i32
    %c0_i32_73 = arith.constant 0 : i32
    %121 = arith.cmpi ne, %120, %c0_i32_73 : i32
    scf.if %121 {
      %c0_i32_80 = arith.constant 0 : i32
      %c13_i32_81 = arith.constant 13 : i32
      %c0_i32_82 = arith.constant 0 : i32
      %130 = tpu.memref_slice %arg2[%c0_i32_80, %c0_i32_82] : memref<32x512xf32, #tpu.memory_space<any>> -> memref<1x512xf32, #tpu.memory_space<any>>
      %131 = tpu.memref_squeeze %130 : memref<1x512xf32, #tpu.memory_space<any>> -> memref<512xf32, #tpu.memory_space<any>>
      %c0_i32_83 = arith.constant 0 : i32
      %132 = tpu.memref_slice %arg3[%c13_i32_81, %c0_i32_83] : memref<16x512xf32, #tpu.memory_space<vmem>> -> memref<1x512xf32, #tpu.memory_space<vmem>>
      %133 = tpu.memref_squeeze %132 : memref<1x512xf32, #tpu.memory_space<vmem>> -> memref<512xf32, #tpu.memory_space<vmem>>
      tpu.wait_dma2 semaphore(%arg4 : memref<!tpu.dma_semaphore, #tpu.memory_space<semaphore_mem>>) src(%131 : memref<512xf32, #tpu.memory_space<any>>) dst(%133 : memref<512xf32, #tpu.memory_space<vmem>>)
    } else {
    }
    %c14_i32_74 = arith.constant 14 : i32
    %122 = arith.addi %1, %c14_i32_74 : i32
    %c12_i32_75 = arith.constant 12 : i32
    %123 = arith.cmpi slt, %122, %c12_i32_75 : i32
    %124 = arith.extui %123 : i1 to i32
    %c0_i32_76 = arith.constant 0 : i32
    %125 = arith.cmpi ne, %124, %c0_i32_76 : i32
    scf.if %125 {
      %c0_i32_80 = arith.constant 0 : i32
      %c14_i32_81 = arith.constant 14 : i32
      %c0_i32_82 = arith.constant 0 : i32
      %130 = tpu.memref_slice %arg2[%c0_i32_80, %c0_i32_82] : memref<32x512xf32, #tpu.memory_space<any>> -> memref<1x512xf32, #tpu.memory_space<any>>
      %131 = tpu.memref_squeeze %130 : memref<1x512xf32, #tpu.memory_space<any>> -> memref<512xf32, #tpu.memory_space<any>>
      %c0_i32_83 = arith.constant 0 : i32
      %132 = tpu.memref_slice %arg3[%c14_i32_81, %c0_i32_83] : memref<16x512xf32, #tpu.memory_space<vmem>> -> memref<1x512xf32, #tpu.memory_space<vmem>>
      %133 = tpu.memref_squeeze %132 : memref<1x512xf32, #tpu.memory_space<vmem>> -> memref<512xf32, #tpu.memory_space<vmem>>
      tpu.wait_dma2 semaphore(%arg4 : memref<!tpu.dma_semaphore, #tpu.memory_space<semaphore_mem>>) src(%131 : memref<512xf32, #tpu.memory_space<any>>) dst(%133 : memref<512xf32, #tpu.memory_space<vmem>>)
    } else {
    }
    %c15_i32_77 = arith.constant 15 : i32
    %126 = arith.addi %1, %c15_i32_77 : i32
    %c12_i32_78 = arith.constant 12 : i32
    %127 = arith.cmpi slt, %126, %c12_i32_78 : i32
    %128 = arith.extui %127 : i1 to i32
    %c0_i32_79 = arith.constant 0 : i32
    %129 = arith.cmpi ne, %128, %c0_i32_79 : i32
    scf.if %129 {
      %c0_i32_80 = arith.constant 0 : i32
      %c15_i32_81 = arith.constant 15 : i32
      %c0_i32_82 = arith.constant 0 : i32
      %130 = tpu.memref_slice %arg2[%c0_i32_80, %c0_i32_82] : memref<32x512xf32, #tpu.memory_space<any>> -> memref<1x512xf32, #tpu.memory_space<any>>
      %131 = tpu.memref_squeeze %130 : memref<1x512xf32, #tpu.memory_space<any>> -> memref<512xf32, #tpu.memory_space<any>>
      %c0_i32_83 = arith.constant 0 : i32
      %132 = tpu.memref_slice %arg3[%c15_i32_81, %c0_i32_83] : memref<16x512xf32, #tpu.memory_space<vmem>> -> memref<1x512xf32, #tpu.memory_space<vmem>>
      %133 = tpu.memref_squeeze %132 : memref<1x512xf32, #tpu.memory_space<vmem>> -> memref<512xf32, #tpu.memory_space<vmem>>
      tpu.wait_dma2 semaphore(%arg4 : memref<!tpu.dma_semaphore, #tpu.memory_space<semaphore_mem>>) src(%131 : memref<512xf32, #tpu.memory_space<any>>) dst(%133 : memref<512xf32, #tpu.memory_space<vmem>>)
    } else {
    }
    return
  }
  func.func @transform_1(%arg0: i32, %arg1: memref<12xi32, #tpu.memory_space<smem>>) -> (i32, i32) {
    %c0_i32 = arith.constant 0 : i32
    %c0_i32_0 = arith.constant 0 : i32
    return %arg0, %c0_i32 : i32, i32
  }
}

</mosaic_0001>

<bundles_post_ra>
// kernel: tpu_custom_call.1
= control target key start
LH: loop header
LB: loop body
LE: loop exit
PB: predicated region body
PF: predicated region fallthrough
CT: control target
= control target key end

     0   :  { %s1160_s0 = inlined_call_operand.hbm [shape: s32[12], index: 0, kind: input, shape index: {}]   ;;  %s1161_s1 = inlined_call_operand.hbm [shape: f32[32,512], index: 1, kind: input, shape index: {}]   ;;  %s1162_s2 = inlined_call_operand.hbm [shape: f32[12,512], index: 2, kind: output, shape index: {}]  }
   0x1   :  { %s530_s11 = scalar_lea.hbm %s1160_s0, 16 }
   0x2   :  { %p531_p0 = scmp.ne.s32.totalorder %s1160_s0, %s530_s11  ;;  %p534_p1 = scmp.lt.u32.totalorder %s530_s11, %s1160_s0 }
   0x4   :  { %p536_p2 = pnand %p534_p1, %p531_p0 }
   0x6   :  { %539 = shalt.err (!%p536_p2)  }
   0x7   :  { %s856_s16 = smov [#allocation4]  }
   0x8   :  { %8 = dma.hbm_to_smem %s1160_s0, 16, %s856_s16, [#allocation3] }
   0x9   :  { %850 = dma.done.wait [#allocation3], 16 }
   0xa   :  { %851 = vsyncadd [#allocation3], 4294967280 }
   0xb   :  { %10 = sfence }
   0xc   :  { %11 = vsyncpa [#allocation6], 0  ;;  %s17_s19 = sld [smem:[#allocation4]]  ;;  %s857_s20 = smov [#allocation5]  }
   0xd   :  { %s25_s21 = sshll.u32 %s857_s20, 4  ;;  %s902_s22 = sld [smem:[#allocation4 + $0x1]]  ;;  %s900_s21 = int_to_ptr.vmem [resolvable:$true] %s25_s21 }
   0xe   :  { %s858_s23 = smov [#allocation5 + $0x1]   ;;  %s904_s25 = sld [smem:[#allocation4 + $0x2]] }
   0xf   :  { %s43_s24 = sshll.u32 %s858_s23, 4  ;;  %s859_s28 = smov [#allocation5 + $0x2]   ;;  %s906_s24 = int_to_ptr.vmem [resolvable:$true] %s43_s24 }
  0x10   :  { %s61_s29 = sshll.u32 %s859_s28, 4  ;;  %s918_s12 = scalar_lea.hbm %s1161_s1, 2048  ;;  %s908_s29 = int_to_ptr.vmem [resolvable:$true] %s61_s29 }
  0x12   :  { %s18_s0 = sshrl.u32 %s17_s19, 3  ;;  %s19_s26 = sand.u32 7, %s17_s19  }
  0x13   :  { %s465_s27 = sshll.u32 %s18_s0, 5  ;;  %s35_s4 = sshrl.u32 %s902_s22, 3 }
  0x14   :  { %s21_s30 = sadd.s32 %s465_s27, %s19_s26  ;;  %s36_s8 = sand.u32 7, %s902_s22  }
  0x15   :  { %s466_s3 = sshll.u32 %s21_s30, 4 }
  0x16   :  { %s23_s7 = scalar_lea.hbm %s1161_s1, %s466_s3 }
  0x17   :  { %s540_s9 = scalar_lea.hbm %s23_s7, 64  ;;  %p543_p4 = scmp.lt.u32.totalorder %s23_s7, %s1161_s1 }
  0x18   :  { %p541_p3 = scmp.ne.s32.totalorder %s23_s7, %s540_s9  ;;  %p544_p5 = scmp.lt.u32.totalorder %s918_s12, %s540_s9 }
  0x19   :  { %p546_p7 = scmp.lt.u32.totalorder %s540_s9, %s23_s7 }
  0x1a   :  { %p545_p6 = por %p544_p5, %p543_p4 }
  0x1c   :  { %p547_p8 = por %p546_p7, %p545_p6 }
  0x1e   :  { %p548_p9 = pnand %p547_p8, %p541_p3 }
  0x20   :  { %551 = shalt.err (!%p548_p9)  }
  0x21   :  { %s552_s15 = scalar_lea.vmem %s900_s21, 64  ;;  %s927_s16 = scalar_lea.vmem %s900_s21, 1024 }
  0x22   :  { %p553_p10 = scmp.ne.s32.totalorder %s900_s21, %s552_s15  ;;  %p557_p11 = scmp.lt.s32.totalorder %s900_s21, %s900_s21 }
  0x23   :  { %p558_p12 = scmp.lt.s32.totalorder %s927_s16, %s552_s15 }
  0x25   :  { %p559_p13 = por %p558_p12, %p557_p11 }
  0x27   :  { %p560_p0 = pnand %p559_p13, %p553_p10 }
  0x29   :  { %563 = shalt.err (!%p560_p0)  }
  0x2a   :  { %s860_s17 = smov 128   ;;  %s861_s18 = smov 1  }
  0x2b   :  { %28 = dma.hbm_to_vmem [thread:$0]  %s23_s7, 64, %s900_s21, [#allocation2], %s860_s17, %s860_s17, %s861_s18 }
  0x2c   :  { %s468_s19 = sshll.u32 %s35_s4, 5  ;;  %s53_s20 = sshrl.u32 %s904_s25, 3 }
  0x2d   :  { %s38_s22 = sadd.s32 %s468_s19, %s36_s8  ;;  %s54_s23 = sand.u32 7, %s904_s25  }
  0x2e   :  { %s469_s0 = sshll.u32 %s38_s22, 4  ;;  %s471_s26 = sshll.u32 %s53_s20, 5 }
  0x2f   :  { %s40_s30 = scalar_lea.hbm %s1161_s1, %s469_s0  ;;  %s56_s3 = sadd.s32 %s471_s26, %s54_s23 }
  0x30   :  { %s564_s5 = scalar_lea.hbm %s40_s30, 64  ;;  %p567_p2 = scmp.lt.u32.totalorder %s40_s30, %s1161_s1 }
  0x31   :  { %p565_p1 = scmp.ne.s32.totalorder %s40_s30, %s564_s5  ;;  %p568_p3 = scmp.lt.u32.totalorder %s918_s12, %s564_s5 }
  0x32   :  { %p570_p5 = scmp.lt.u32.totalorder %s564_s5, %s40_s30 }
  0x33   :  { %p569_p4 = por %p568_p3, %p567_p2 }
  0x35   :  { %p571_p6 = por %p570_p5, %p569_p4 }
  0x37   :  { %p572_p7 = pnand %p571_p6, %p565_p1 }
  0x39   :  { %575 = shalt.err (!%p572_p7)  }
  0x3a   :  { %s576_s25 = scalar_lea.vmem %s906_s24, 64  ;;  %p581_p9 = scmp.lt.s32.totalorder %s906_s24, %s900_s21 }
  0x3b   :  { %p577_p8 = scmp.ne.s32.totalorder %s906_s24, %s576_s25  ;;  %p582_p10 = scmp.lt.s32.totalorder %s927_s16, %s576_s25 }
  0x3d   :  { %p583_p12 = por %p582_p10, %p581_p9 }
  0x3f   :  { %p584_p13 = pnand %p583_p12, %p577_p8 }
  0x41   :  { %587 = shalt.err (!%p584_p13)  }
  0x42   :  { %46 = dma.hbm_to_vmem [thread:$0]  %s40_s30, 64, %s906_s24, [#allocation2], %s860_s17, %s860_s17, %s861_s18 }
  0x43   :  { %s472_s4 = sshll.u32 %s56_s3, 4  ;;  %s957_s7 = sld [smem:[#allocation4 + $0x3]] }
  0x44   :  { %s58_s11 = scalar_lea.hbm %s1161_s1, %s472_s4 }
  0x45   :  { %s588_s13 = scalar_lea.hbm %s58_s11, 64  ;;  %p591_p1 = scmp.lt.u32.totalorder %s58_s11, %s1161_s1 }
  0x46   :  { %p589_p0 = scmp.ne.s32.totalorder %s58_s11, %s588_s13  ;;  %p592_p2 = scmp.lt.u32.totalorder %s918_s12, %s588_s13 }
  0x47   :  { %p594_p4 = scmp.lt.u32.totalorder %s588_s13, %s58_s11 }
  0x48   :  { %p593_p3 = por %p592_p2, %p591_p1 }
  0x4a   :  { %p595_p5 = por %p594_p4, %p593_p3 }
  0x4c   :  { %p596_p6 = pnand %p595_p5, %p589_p0 }
  0x4e   :  { %599 = shalt.err (!%p596_p6)  }
  0x4f   :  { %s600_s24 = scalar_lea.vmem %s908_s29, 64  ;;  %p605_p8 = scmp.lt.s32.totalorder %s908_s29, %s900_s21 }
  0x50   :  { %p601_p7 = scmp.ne.s32.totalorder %s908_s29, %s600_s24  ;;  %p606_p9 = scmp.lt.s32.totalorder %s927_s16, %s600_s24 }
  0x52   :  { %p607_p10 = por %p606_p9, %p605_p8 }
  0x54   :  { %p608_p12 = pnand %p607_p10, %p601_p7 }
  0x56   :  { %611 = shalt.err (!%p608_p12)  }
  0x57   :  { %64 = dma.hbm_to_vmem [thread:$0]  %s58_s11, 64, %s908_s29, [#allocation2], %s860_s17, %s860_s17, %s861_s18 }
  0x58   :  { %s862_s19 = smov [#allocation5 + $0x3]   ;;  %s975_s22 = sld [smem:[#allocation4 + $0x4]] }
  0x59   :  { %s79_s20 = sshll.u32 %s862_s19, 4  ;;  %s863_s23 = smov [#allocation5 + $0x4]   ;;  %s977_s20 = int_to_ptr.vmem [resolvable:$true] %s79_s20 }
  0x5a   :  { %s97_s0 = sshll.u32 %s863_s23, 4  ;;  %s979_s26 = sld [smem:[#allocation4 + $0x5]]  ;;  %s983_s0 = int_to_ptr.vmem [resolvable:$true] %s97_s0 }
  0x5b   :  { %s71_s27 = sshrl.u32 %s957_s7, 3  ;;  %s72_s28 = sand.u32 7, %s957_s7  }
  0x5c   :  { %s474_s30 = sshll.u32 %s71_s27, 5 }
  0x5d   :  { %s74_s3 = sadd.s32 %s474_s30, %s72_s28 }
  0x5e   :  { %s475_s29 = sshll.u32 %s74_s3, 4  ;;  %s89_s5 = sshrl.u32 %s975_s22, 3 }
  0x5f   :  { %s76_s25 = scalar_lea.hbm %s1161_s1, %s475_s29  ;;  %s90_s4 = sand.u32 7, %s975_s22  }
  0x60   :  { %s612_s8 = scalar_lea.hbm %s76_s25, 64  ;;  %p615_p0 = scmp.lt.u32.totalorder %s76_s25, %s1161_s1 }
  0x61   :  { %p613_p13 = scmp.ne.s32.totalorder %s76_s25, %s612_s8  ;;  %p616_p1 = scmp.lt.u32.totalorder %s918_s12, %s612_s8 }
  0x62   :  { %p618_p3 = scmp.lt.u32.totalorder %s612_s8, %s76_s25 }
  0x63   :  { %p617_p2 = por %p616_p1, %p615_p0 }
  0x65   :  { %p619_p4 = por %p618_p3, %p617_p2 }
  0x67   :  { %p620_p5 = pnand %p619_p4, %p613_p13 }
  0x69   :  { %623 = shalt.err (!%p620_p5)  }
  0x6a   :  { %s624_s7 = scalar_lea.vmem %s977_s20, 64  ;;  %p629_p7 = scmp.lt.s32.totalorder %s977_s20, %s900_s21 }
  0x6b   :  { %p625_p6 = scmp.ne.s32.totalorder %s977_s20, %s624_s7  ;;  %p630_p8 = scmp.lt.s32.totalorder %s927_s16, %s624_s7 }
  0x6d   :  { %p631_p9 = por %p630_p8, %p629_p7 }
  0x6f   :  { %p632_p10 = pnand %p631_p9, %p625_p6 }
  0x71   :  { %635 = shalt.err (!%p632_p10)  }
  0x72   :  { %82 = dma.hbm_to_vmem [thread:$0]  %s76_s25, 64, %s977_s20, [#allocation2], %s860_s17, %s860_s17, %s861_s18 }
  0x73   :  { %s477_s13 = sshll.u32 %s89_s5, 5  ;;  %s107_s14 = sshrl.u32 %s979_s26, 3 }
  0x74   :  { %s92_s15 = sadd.s32 %s477_s13, %s90_s4  ;;  %s108_s24 = sand.u32 7, %s979_s26  }
  0x75   :  { %s478_s19 = sshll.u32 %s92_s15, 4  ;;  %s480_s22 = sshll.u32 %s107_s14, 5 }
  0x76   :  { %s94_s28 = scalar_lea.hbm %s1161_s1, %s478_s19  ;;  %s110_s30 = sadd.s32 %s480_s22, %s108_s24 }
  0x77   :  { %s636_s3 = scalar_lea.hbm %s94_s28, 64  ;;  %p639_p13 = scmp.lt.u32.totalorder %s94_s28, %s1161_s1 }
  0x78   :  { %p637_p12 = scmp.ne.s32.totalorder %s94_s28, %s636_s3  ;;  %p640_p0 = scmp.lt.u32.totalorder %s918_s12, %s636_s3 }
  0x79   :  { %p642_p2 = scmp.lt.u32.totalorder %s636_s3, %s94_s28 }
  0x7a   :  { %p641_p1 = por %p640_p0, %p639_p13 }
  0x7c   :  { %p643_p3 = por %p642_p2, %p641_p1 }
  0x7e   :  { %p644_p4 = pnand %p643_p3, %p637_p12 }
  0x80   :  { %647 = shalt.err (!%p644_p4)  }
  0x81   :  { %s648_s20 = scalar_lea.vmem %s983_s0, 64  ;;  %p653_p6 = scmp.lt.s32.totalorder %s983_s0, %s900_s21 }
  0x82   :  { %p649_p5 = scmp.ne.s32.totalorder %s983_s0, %s648_s20  ;;  %p654_p7 = scmp.lt.s32.totalorder %s927_s16, %s648_s20 }
  0x84   :  { %p655_p8 = por %p654_p7, %p653_p6 }
  0x86   :  { %p656_p9 = pnand %p655_p8, %p649_p5 }
  0x88   :  { %659 = shalt.err (!%p656_p9)  }
  0x89   :  { %100 = dma.hbm_to_vmem [thread:$0]  %s94_s28, 64, %s983_s0, [#allocation2], %s860_s17, %s860_s17, %s861_s18 }
  0x8a   :  { %s481_s26 = sshll.u32 %s110_s30, 4  ;;  %s864_s5 = smov [#allocation5 + $0x5]  }
  0x8b   :  { %s115_s9 = sshll.u32 %s864_s5, 4  ;;  %s112_s8 = scalar_lea.hbm %s1161_s1, %s481_s26  ;;  %s116_s9 = int_to_ptr.vmem [resolvable:$true] %s115_s9 }
  0x8c   :  { %s660_s10 = scalar_lea.hbm %s112_s8, 64  ;;  %p663_p12 = scmp.lt.u32.totalorder %s112_s8, %s1161_s1 }
  0x8d   :  { %p661_p10 = scmp.ne.s32.totalorder %s112_s8, %s660_s10  ;;  %p664_p13 = scmp.lt.u32.totalorder %s918_s12, %s660_s10 }
  0x8e   :  { %p666_p1 = scmp.lt.u32.totalorder %s660_s10, %s112_s8 }
  0x8f   :  { %p665_p0 = por %p664_p13, %p663_p12 }
  0x91   :  { %p667_p2 = por %p666_p1, %p665_p0 }
  0x93   :  { %p668_p3 = pnand %p667_p2, %p661_p10 }
  0x95   :  { %671 = shalt.err (!%p668_p3)  }
  0x96   :  { %s672_s0 = scalar_lea.vmem %s116_s9, 64  ;;  %p677_p5 = scmp.lt.s32.totalorder %s116_s9, %s900_s21 }
  0x97   :  { %p673_p4 = scmp.ne.s32.totalorder %s116_s9, %s672_s0  ;;  %p678_p6 = scmp.lt.s32.totalorder %s927_s16, %s672_s0 }
  0x99   :  { %p679_p7 = por %p678_p6, %p677_p5 }
  0x9b   :  { %p680_p8 = pnand %p679_p7, %p673_p4 }
  0x9d   :  { %683 = shalt.err (!%p680_p8)  }
  0x9e   :  { %118 = dma.hbm_to_vmem [thread:$0]  %s112_s8, 64, %s116_s9, [#allocation2], %s860_s17, %s860_s17, %s861_s18 }
  0x9f   :  { %s482_s13 = sld [smem:[#allocation4 + $0x6]]  ;;  %s865_s14 = smov [#allocation5 + $0x6]  }
  0xa0   :  { %s133_s15 = sshll.u32 %s865_s14, 4  ;;  %s485_s24 = sld [smem:[#allocation4 + $0x7]]  ;;  %s1033_s15 = int_to_ptr.vmem [resolvable:$true] %s133_s15 }
  0xa1   :  { %s866_s19 = smov [#allocation5 + $0x7]   ;;  %s1035_s23 = sld [smem:[#allocation4 + $0x8]] }
  0xa2   :  { %s151_s22 = sshll.u32 %s866_s19, 4  ;;  %s867_s27 = smov [#allocation5 + $0x20]   ;;  %s1037_s22 = int_to_ptr.vmem [resolvable:$true] %s151_s22 }
  0xa3   :  { %s1039_s28 = sshll.u32 %s867_s27, 4  ;;  %s1041_s30 = sld [smem:[#allocation4 + $0x9]]  ;;  %s170_s28 = int_to_ptr.vmem [resolvable:$true] %s1039_s28 }
  0xa5   :  { %s125_s3 = sshrl.u32 %s482_s13, 3  ;;  %s126_s29 = sand.u32 7, %s482_s13  }
  0xa6   :  { %s483_s6 = sshll.u32 %s125_s3, 5  ;;  %s143_s20 = sshrl.u32 %s485_s24, 3 }
  0xa7   :  { %s128_s26 = sadd.s32 %s483_s6, %s126_s29  ;;  %s144_s5 = sand.u32 7, %s485_s24  }
  0xa8   :  { %s484_s9 = sshll.u32 %s128_s26, 4  ;;  %s486_s25 = sshll.u32 %s143_s20, 5 }
  0xa9   :  { %s130_s10 = scalar_lea.hbm %s1161_s1, %s484_s9  ;;  %s146_s11 = sadd.s32 %s486_s25, %s144_s5 }
  0xaa   :  { %s684_s7 = scalar_lea.hbm %s130_s10, 64  ;;  %p687_p10 = scmp.lt.u32.totalorder %s130_s10, %s1161_s1 }
  0xab   :  { %p685_p9 = scmp.ne.s32.totalorder %s130_s10, %s684_s7  ;;  %p688_p12 = scmp.lt.u32.totalorder %s918_s12, %s684_s7 }
  0xac   :  { %p690_p0 = scmp.lt.u32.totalorder %s684_s7, %s130_s10 }
  0xad   :  { %p689_p13 = por %p688_p12, %p687_p10 }
  0xaf   :  { %p691_p1 = por %p690_p0, %p689_p13 }
  0xb1   :  { %p692_p2 = pnand %p691_p1, %p685_p9 }
  0xb3   :  { %695 = shalt.err (!%p692_p2)  }
  0xb4   :  { %s696_s13 = scalar_lea.vmem %s1033_s15, 64  ;;  %p701_p4 = scmp.lt.s32.totalorder %s1033_s15, %s900_s21 }
  0xb5   :  { %p697_p3 = scmp.ne.s32.totalorder %s1033_s15, %s696_s13  ;;  %p702_p5 = scmp.lt.s32.totalorder %s927_s16, %s696_s13 }
  0xb7   :  { %p703_p6 = por %p702_p5, %p701_p4 }
  0xb9   :  { %p704_p7 = pnand %p703_p6, %p697_p3 }
  0xbb   :  { %707 = shalt.err (!%p704_p7)  }
  0xbc   :  { %136 = dma.hbm_to_vmem [thread:$0]  %s130_s10, 64, %s1033_s15, [#allocation2], %s860_s17, %s860_s17, %s861_s18 }
  0xbd   :  { %s487_s24 = sshll.u32 %s146_s11, 4  ;;  %s161_s19 = sshrl.u32 %s1035_s23, 3 }
  0xbe   :  { %s148_s29 = scalar_lea.hbm %s1161_s1, %s487_s24  ;;  %s162_s6 = sand.u32 7, %s1035_s23  }
  0xbf   :  { %s708_s20 = scalar_lea.hbm %s148_s29, 64  ;;  %p711_p9 = scmp.lt.u32.totalorder %s148_s29, %s1161_s1 }
  0xc0   :  { %p709_p8 = scmp.ne.s32.totalorder %s148_s29, %s708_s20  ;;  %p712_p10 = scmp.lt.u32.totalorder %s918_s12, %s708_s20 }
  0xc1   :  { %p714_p13 = scmp.lt.u32.totalorder %s708_s20, %s148_s29 }
  0xc2   :  { %p713_p12 = por %p712_p10, %p711_p9 }
  0xc4   :  { %p715_p0 = por %p714_p13, %p713_p12 }
  0xc6   :  { %p716_p1 = pnand %p715_p0, %p709_p8 }
  0xc8   :  { %719 = shalt.err (!%p716_p1)  }
  0xc9   :  { %s720_s15 = scalar_lea.vmem %s1037_s22, 64  ;;  %p725_p3 = scmp.lt.s32.totalorder %s1037_s22, %s900_s21 }
  0xca   :  { %p721_p2 = scmp.ne.s32.totalorder %s1037_s22, %s720_s15  ;;  %p726_p4 = scmp.lt.s32.totalorder %s927_s16, %s720_s15 }
  0xcc   :  { %p727_p5 = por %p726_p4, %p725_p3 }
  0xce   :  { %p728_p6 = pnand %p727_p5, %p721_p2 }
  0xd0   :  { %731 = shalt.err (!%p728_p6)  }
  0xd1   :  { %154 = dma.hbm_to_vmem [thread:$0]  %s148_s29, 64, %s1037_s22, [#allocation2], %s860_s17, %s860_s17, %s861_s18 }
  0xd2   :  { %s489_s23 = sshll.u32 %s161_s19, 5  ;;  %s179_s25 = sshrl.u32 %s1041_s30, 3 }
  0xd3   :  { %s164_s9 = sadd.s32 %s489_s23, %s162_s6  ;;  %s180_s8 = sand.u32 7, %s1041_s30  }
  0xd4   :  { %s490_s4 = sshll.u32 %s164_s9, 4  ;;  %s492_s0 = sshll.u32 %s179_s25, 5 }
  0xd5   :  { %s166_s7 = scalar_lea.hbm %s1161_s1, %s490_s4 }
  0xd6   :  { %s732_s14 = scalar_lea.hbm %s166_s7, 64  ;;  %p735_p8 = scmp.lt.u32.totalorder %s166_s7, %s1161_s1 }
  0xd7   :  { %p733_p7 = scmp.ne.s32.totalorder %s166_s7, %s732_s14  ;;  %p736_p9 = scmp.lt.u32.totalorder %s918_s12, %s732_s14 }
  0xd8   :  { %p738_p12 = scmp.lt.u32.totalorder %s732_s14, %s166_s7 }
  0xd9   :  { %p737_p10 = por %p736_p9, %p735_p8 }
  0xdb   :  { %p739_p13 = por %p738_p12, %p737_p10 }
  0xdd   :  { %p740_p0 = pnand %p739_p13, %p733_p7 }
  0xdf   :  { %743 = shalt.err (!%p740_p0)  }
  0xe0   :  { %s744_s22 = scalar_lea.vmem %s170_s28, 64  ;;  %p749_p2 = scmp.lt.s32.totalorder %s170_s28, %s900_s21 }
  0xe1   :  { %p745_p1 = scmp.ne.s32.totalorder %s170_s28, %s744_s22  ;;  %p750_p3 = scmp.lt.s32.totalorder %s927_s16, %s744_s22 }
  0xe3   :  { %p751_p4 = por %p750_p3, %p749_p2 }
  0xe5   :  { %p752_p5 = pnand %p751_p4, %p745_p1 }
  0xe7   :  { %755 = shalt.err (!%p752_p5)  }
  0xe8   :  { %172 = dma.hbm_to_vmem [thread:$0]  %s166_s7, 64, %s170_s28, [#allocation2], %s860_s17, %s860_s17, %s861_s18 }
  0xe9   :  { %s182_s30 = sadd.s32 %s492_s0, %s180_s8  ;;  %s868_s27 = smov [#allocation5 + $0x21]  }
  0xea   :  { %s493_s19 = sshll.u32 %s182_s30, 4  ;;  %s187_s3 = sshll.u32 %s868_s27, 4  ;;  %s188_s3 = int_to_ptr.vmem [resolvable:$true] %s187_s3 }
  0xeb   :  { %s184_s20 = scalar_lea.hbm %s1161_s1, %s493_s19 }
  0xec   :  { %s756_s26 = scalar_lea.hbm %s184_s20, 64  ;;  %p759_p7 = scmp.lt.u32.totalorder %s184_s20, %s1161_s1 }
  0xed   :  { %p757_p6 = scmp.ne.s32.totalorder %s184_s20, %s756_s26  ;;  %p760_p8 = scmp.lt.u32.totalorder %s918_s12, %s756_s26 }
  0xee   :  { %p762_p10 = scmp.lt.u32.totalorder %s756_s26, %s184_s20 }
  0xef   :  { %p761_p9 = por %p760_p8, %p759_p7 }
  0xf1   :  { %p763_p12 = por %p762_p10, %p761_p9 }
  0xf3   :  { %p764_p13 = pnand %p763_p12, %p757_p6 }
  0xf5   :  { %767 = shalt.err (!%p764_p13)  }
  0xf6   :  { %s768_s28 = scalar_lea.vmem %s188_s3, 64  ;;  %p773_p1 = scmp.lt.s32.totalorder %s188_s3, %s900_s21 }
  0xf7   :  { %p769_p0 = scmp.ne.s32.totalorder %s188_s3, %s768_s28  ;;  %p774_p2 = scmp.lt.s32.totalorder %s927_s16, %s768_s28 }
  0xf9   :  { %p775_p3 = por %p774_p2, %p773_p1 }
  0xfb   :  { %p776_p4 = pnand %p775_p3, %p769_p0 }
  0xfd   :  { %779 = shalt.err (!%p776_p4)  }
  0xfe   :  { %190 = dma.hbm_to_vmem [thread:$0]  %s184_s20, 64, %s188_s3, [#allocation2], %s860_s17, %s860_s17, %s861_s18 }
  0xff   :  { %s494_s23 = sld [smem:[#allocation4 + $0xa]]  ;;  %s497_s9 = sld [smem:[#allocation4 + $0xb]] }
 0x100   :  { %s869_s25 = smov [#allocation5 + $0x22]   ;;  %s870_s8 = smov [#allocation5 + $0x23]  }
 0x101   :  { %s205_s4 = sshll.u32 %s869_s25, 4  ;;  %s223_s10 = sshll.u32 %s870_s8, 4  ;;  %s1104_s4 = int_to_ptr.vmem [resolvable:$true] %s205_s4  ;;  %s1106_s10 = int_to_ptr.vmem [resolvable:$true] %s223_s10 }
 0x105   :  { %s197_s11 = sshrl.u32 %s494_s23, 3  ;;  %s198_s7 = sand.u32 7, %s494_s23  }
 0x106   :  { %s495_s0 = sshll.u32 %s197_s11, 5  ;;  %s215_s14 = sshrl.u32 %s497_s9, 3 }
 0x107   :  { %s200_s13 = sadd.s32 %s495_s0, %s198_s7  ;;  %s216_s24 = sand.u32 7, %s497_s9  }
 0x108   :  { %s496_s22 = sshll.u32 %s200_s13, 4  ;;  %s498_s30 = sshll.u32 %s215_s14, 5 }
 0x109   :  { %s202_s3 = scalar_lea.hbm %s1161_s1, %s496_s22  ;;  %s218_s29 = sadd.s32 %s498_s30, %s216_s24 }
 0x10a   :  { %s780_s6 = scalar_lea.hbm %s202_s3, 64  ;;  %p783_p6 = scmp.lt.u32.totalorder %s202_s3, %s1161_s1 }
 0x10b   :  { %p781_p5 = scmp.ne.s32.totalorder %s202_s3, %s780_s6  ;;  %p784_p7 = scmp.lt.u32.totalorder %s918_s12, %s780_s6 }
 0x10c   :  { %p786_p9 = scmp.lt.u32.totalorder %s780_s6, %s202_s3 }
 0x10d   :  { %p785_p8 = por %p784_p7, %p783_p6 }
 0x10f   :  { %p787_p10 = por %p786_p9, %p785_p8 }
 0x111   :  { %p788_p12 = pnand %p787_p10, %p781_p5 }
 0x113   :  { %791 = shalt.err (!%p788_p12)  }
 0x114   :  { %s792_s5 = scalar_lea.vmem %s1104_s4, 64  ;;  %p797_p0 = scmp.lt.s32.totalorder %s1104_s4, %s900_s21 }
 0x115   :  { %p793_p13 = scmp.ne.s32.totalorder %s1104_s4, %s792_s5  ;;  %p798_p1 = scmp.lt.s32.totalorder %s927_s16, %s792_s5 }
 0x117   :  { %p799_p2 = por %p798_p1, %p797_p0 }
 0x119   :  { %p800_p3 = pnand %p799_p2, %p793_p13 }
 0x11b   :  { %803 = shalt.err (!%p800_p3)  }
 0x11c   :  { %208 = dma.hbm_to_vmem [thread:$0]  %s202_s3, 64, %s1104_s4, [#allocation2], %s860_s17, %s860_s17, %s861_s18 }
 0x11d   :  { %s499_s15 = sshll.u32 %s218_s29, 4 }
 0x11e   :  { %s220_s9 = scalar_lea.hbm %s1161_s1, %s499_s15 }
 0x11f   :  { %s804_s25 = scalar_lea.hbm %s220_s9, 64  ;;  %p807_p5 = scmp.lt.u32.totalorder %s220_s9, %s1161_s1 }
 0x120   :  { %p805_p4 = scmp.ne.s32.totalorder %s220_s9, %s804_s25  ;;  %p808_p6 = scmp.lt.u32.totalorder %s918_s12, %s804_s25 }
 0x121   :  { %p810_p8 = scmp.lt.u32.totalorder %s804_s25, %s220_s9 }
 0x122   :  { %p809_p7 = por %p808_p6, %p807_p5 }
 0x124   :  { %p811_p9 = por %p810_p8, %p809_p7 }
 0x126   :  { %p812_p10 = pnand %p811_p9, %p805_p4 }
 0x128   :  { %815 = shalt.err (!%p812_p10)  }
 0x129   :  { %s816_s4 = scalar_lea.vmem %s1106_s10, 64  ;;  %p821_p13 = scmp.lt.s32.totalorder %s1106_s10, %s900_s21 }
 0x12a   :  { %p817_p12 = scmp.ne.s32.totalorder %s1106_s10, %s816_s4  ;;  %p822_p0 = scmp.lt.s32.totalorder %s927_s16, %s816_s4 }
 0x12c   :  { %p823_p1 = por %p822_p0, %p821_p13 }
 0x12e   :  { %p824_p2 = pnand %p823_p1, %p817_p12 }
 0x130   :  { %827 = shalt.err (!%p824_p2)  }
 0x131   :  { %226 = dma.hbm_to_vmem [thread:$0]  %s220_s9, 64, %s1106_s10, [#allocation2], %s860_s17, %s860_s17, %s861_s18 }
 0x132   :  { %852 = dma.done.wait [#allocation2], 768 }
 0x133   :  { %853 = vsyncadd [#allocation2], 4294966528  ;;  %p829_p3 = scmp.ne.s32.totalorder %s900_s21, %s927_s16  ;;  %p834_p4 = scmp.lt.s32.totalorder %s927_s16, %s927_s16 }
 0x135   :  { %p835_p5 = por %p834_p4, %p557_p11 }
 0x137   :  { %p836_p6 = pnand %p835_p5, %p829_p3 }
 0x139   :  { %839 = shalt.err (!%p836_p6)
}
 0x13a   :  { %s840_s7 = scalar_lea.hbm %s1162_s2, 1024 }
 0x13b   :  { %p841_p7 = scmp.ne.s32.totalorder %s1162_s2, %s840_s7  ;;  %p844_p8 = scmp.lt.u32.totalorder %s840_s7, %s1162_s2 }
 0x13d   :  { %p846_p9 = pnand %p844_p8, %p841_p7 }
 0x13f   :  { %849 = shalt.err (!%p846_p9)
}
 0x140   :  { %s871_s14 = smov 512   ;;  %s872_s16 = smov 32  }
 0x141   :  { %390 = dma.vmem_to_hbm [thread:$0]  %s900_s21, 1024, %s1162_s2, [#allocation6], %s871_s14, %s871_s14, %s872_s16  }
 0x142   :  { %854 = dma.done.wait [#allocation6], 1024  }
 0x143   :  { %855 = vsyncadd [#allocation6], 4294966272 }
 0x144   :  { %394 = vsyncpa [#allocation6], 1 }
 0x145   :  { %395 = vsyncmov [#allocation2] }
 0x148   :  { %s396_s22 = vpop.sfrf %395 }
 0x149   :  { %p512_p11 = scmp.ne.s32.totalorder %s396_s22, 0 }
 0x14b   :  { %400 = shalt.err (%p512_p11)  }

</bundles_post_ra>
